<compile_context>
chip_gen: v5e
topology: v5e:2x2
jax: 0.10.0
libtpu: 0.0.40
codegen_flags: <defaults>
</compile_context>

<pallas_src>
import functools

import jax
import jax.numpy as jnp
import numpy as np
from jax import lax
from jax.experimental import pallas as pl
from jax.experimental.pallas import tpu as pltpu

_BN_EPS = 1e-5
_VMEM_LIMIT_BYTES = 32 * 1024 * 1024  # safe scoped-VMEM budget on v5e/v6e/v7x


# ------------------------------- fused kernel ------------------------------ #

def _ir_kernel(*refs, H, W, stride, use_res, has_expand):
    """One image per grid step.  Ref order:
         x, [w_exp, b1], w_dw, b2, w_proj, b3, [sel], out, hid(scratch)
    """
    it = iter(refs)
    x_ref = next(it)
    we_ref = next(it) if has_expand else None
    b1_ref = next(it) if has_expand else None
    wd_ref = next(it)
    b2_ref = next(it)
    wp_ref = next(it)
    b3_ref = next(it)
    sel_ref = next(it) if stride != 1 else None
    o_ref = next(it)
    hid_ref = next(it)

    chid = wd_ref.shape[2]

    # Input rows for this image: (H*W, Cin).  Reused below as the residual
    # (use_res implies Cin == Cout and stride == 1).
    x2d = x_ref[...].astype(jnp.float32)

    # -- 1x1 expand (BN scale pre-folded into w_exp) + bias + ReLU6 ---------- #
    if has_expand:
        h = jnp.dot(x2d, we_ref[...], preferred_element_type=jnp.float32)
        h = jnp.clip(h + b1_ref[...], 0.0, 6.0)
    else:
        h = x2d                                      # expand_ratio == 1

    # -- stage hidden activation in a zero-padded VMEM scratch --------------- #
    # Fully rewritten each grid step (keeps the "parallel" batch axis safe).
    hid_ref[...] = jnp.zeros_like(hid_ref)
    hid_ref[1:H + 1, 1:W + 1, :] = h.reshape(H, W, chid)

    # -- 3x3 depthwise conv ("same" pad) + bias + ReLU6 ----------------------- #
    wd = wd_ref[...]                                 # loaded once; 9 taps reuse
    acc = jnp.zeros((H, W, chid), jnp.float32)
    for kh in range(3):
        for kw in range(3):
            acc = acc + hid_ref[kh:kh + H, kw:kw + W, :] * wd[kh, kw]
    y = jnp.clip(acc + b2_ref[...], 0.0, 6.0)
    y2d = y.reshape(H * W, chid)

    # -- stride-2 subsampling via a small 0/1 selection matmul (MXU) --------- #
    if sel_ref is not None:
        y2d = jnp.dot(sel_ref[...], y2d, preferred_element_type=jnp.float32)

    # -- 1x1 project (BN scale pre-folded into w_proj) + bias (+ residual) --- #
    out = jnp.dot(y2d, wp_ref[...], preferred_element_type=jnp.float32)
    out = out + b3_ref[...]
    if use_res:
        out = out + x2d
    o_ref[...] = out.astype(o_ref.dtype)


# ------------------------------ kernel wrapper ------------------------------ #

def _subsample_matrix(H, W, stride):
    """(Ho*Wo, H*W) 0/1 matrix selecting flattened pixel (stride*i, stride*j)."""
    Ho = (H - 1) // stride + 1
    Wo = (W - 1) // stride + 1
    rows = np.arange(Ho * Wo)
    src = (rows // Wo) * stride * W + (rows % Wo) * stride
    sel = np.zeros((Ho * Wo, H * W), np.float32)
    sel[rows, src] = 1.0
    return jnp.asarray(sel)


def _inverted_residual_pallas(x2d, params, *, N, H, W, Cin, Cout, stride,
                              has_expand, use_res):
    """x2d: (N*H*W, Cin) NHWC-flattened input.  Returns ((N*Ho*Wo, Cout), Ho, Wo)."""
    chid = params["w_dw"].shape[2]
    Ho = (H - 1) // stride + 1
    Wo = (W - 1) // stride + 1

    kernel = functools.partial(_ir_kernel, H=H, W=W, stride=stride,
                               use_res=use_res, has_expand=has_expand)

    in_specs = [pl.BlockSpec((H * W, Cin), lambda n: (n, 0))]
    args = [x2d]
    if has_expand:
        in_specs += [pl.BlockSpec((Cin, chid), lambda n: (0, 0)),
                     pl.BlockSpec((1, chid), lambda n: (0, 0))]
        args += [params["w_exp"], params["b1"].reshape(1, chid)]
    in_specs += [pl.BlockSpec((3, 3, chid), lambda n: (0, 0, 0)),
                 pl.BlockSpec((1, chid), lambda n: (0, 0)),
                 pl.BlockSpec((chid, Cout), lambda n: (0, 0)),
                 pl.BlockSpec((1, Cout), lambda n: (0, 0))]
    args += [params["w_dw"], params["b2"].reshape(1, chid),
             params["w_proj"], params["b3"].reshape(1, Cout)]
    if stride != 1:
        in_specs += [pl.BlockSpec((Ho * Wo, H * W), lambda n: (0, 0))]
        args += [_subsample_matrix(H, W, stride)]

    out2d = pl.pallas_call(
        kernel,
        out_shape=jax.ShapeDtypeStruct((N * Ho * Wo, Cout), x2d.dtype),
        grid_spec=pltpu.PrefetchScalarGridSpec(
            num_scalar_prefetch=0,
            grid=(N,),
            in_specs=in_specs,
            out_specs=pl.BlockSpec((Ho * Wo, Cout), lambda n: (n, 0)),
            scratch_shapes=[pltpu.VMEM((H + 2, W + 2, chid), jnp.float32)]),
        compiler_params=pltpu.CompilerParams(
            dimension_semantics=("parallel",),
            vmem_limit_bytes=_VMEM_LIMIT_BYTES),
    )(*args)
    return out2d, Ho, Wo


# ------------------------- parameter init / forward ------------------------- #

def _fold_bn(gamma, beta, mean, var):
    scale = gamma / jnp.sqrt(var + _BN_EPS)
    bias = beta - mean * scale
    return scale, bias


def init_params(key, inp, oup, expand_ratio):
    """Random conv weights + BN stats; BN scales folded into the weights."""
    hidden = int(round(inp * expand_ratio))
    ks = jax.random.split(key, 15)

    def bn(k0, k1, k2, k3, c):
        gamma = 1.0 + 0.1 * jax.random.normal(k0, (c,), jnp.float32)
        beta = 0.1 * jax.random.normal(k1, (c,), jnp.float32)
        mean = 0.1 * jax.random.normal(k2, (c,), jnp.float32)
        var = jax.random.uniform(k3, (c,), jnp.float32, 0.5, 1.5)
        return _fold_bn(gamma, beta, mean, var)

    params = {"hidden": hidden}
    if expand_ratio != 1:
        w = 0.1 * jax.random.normal(ks[0], (inp, hidden), jnp.float32)
        s1, b1 = bn(ks[1], ks[2], ks[3], ks[4], hidden)
        params.update(w_exp_raw=w, s1=s1, b1=b1,
                      w_exp=w * s1[None, :])                 # folded (kernel)
    wdw = 0.1 * jax.random.normal(ks[5], (3, 3, hidden), jnp.float32)
    s2, b2 = bn(ks[6], ks[7], ks[8], ks[9], hidden)
    params.update(w_dw_raw=wdw, s2=s2, b2=b2,
                  w_dw=wdw * s2[None, None, :])              # folded (kernel)
    wp = 0.1 * jax.random.normal(ks[10], (hidden, oup), jnp.float32)
    s3, b3 = bn(ks[11], ks[12], ks[13], ks[14], oup)
    params.update(w_proj_raw=wp, s3=s3, b3=b3,
                  w_proj=wp * s3[None, :])                   # folded (kernel)
    return params


def inverted_residual_forward_nhwc(x_nhwc, params, *, inp, oup, stride,
                                   expand_ratio):
    """NHWC-boundary forward (preferred when chaining FeatherNet blocks)."""
    assert stride in (1, 2)
    use_res = (stride == 1) and (inp == oup)
    has_expand = expand_ratio != 1
    # TODO(synk): `downsample` is an arbitrary user-supplied nn.Module; the
    # FeatherNet config here uses downsample=None, so that branch is omitted.
    N, H, W, Cin = x_nhwc.shape
    x2d = x_nhwc.reshape(N * H * W, Cin)          # contiguous reshape (free)
    out2d, Ho, Wo = _inverted_residual_pallas(
        x2d, params, N=N, H=H, W=W, Cin=Cin, Cout=oup, stride=stride,
        has_expand=has_expand, use_res=use_res)
    return out2d.reshape(N, Ho, Wo, oup)


def inverted_residual_forward(x_nchw, params, *, inp, oup, stride,
                              expand_ratio):
    """Drop-in NCHW wrapper matching the PyTorch module's layout."""
    x = jnp.transpose(x_nchw, (0, 2, 3, 1))
    out = inverted_residual_forward_nhwc(x, params, inp=inp, oup=oup,
                                         stride=stride,
                                         expand_ratio=expand_ratio)
    return jnp.transpose(out, (0, 3, 1, 2))


# ----------------------------- pure-JAX reference --------------------------- #

def reference_forward(x_nchw, params, *, inp, oup, stride, expand_ratio):
    use_res_connect = (stride == 1) and (inp == oup)
    hidden = params["hidden"]
    dn = ("NCHW", "OIHW", "NCHW")
    prec = lax.Precision.HIGHEST

    h = x_nchw
    if expand_ratio != 1:
        w = jnp.transpose(params["w_exp_raw"], (1, 0))[:, :, None, None]
        h = lax.conv_general_dilated(h, w, (1, 1), "VALID",
                                     dimension_numbers=dn, precision=prec)
        h = h * params["s1"][None, :, None, None] + params["b1"][None, :, None, None]
        h = jnp.clip(h, 0.0, 6.0)

    wdw = jnp.transpose(params["w_dw_raw"], (2, 0, 1))[:, None, :, :]
    h = lax.conv_general_dilated(h, wdw, (stride, stride), ((1, 1), (1, 1)),
                                 dimension_numbers=dn,
                                 feature_group_count=hidden, precision=prec)
    h = h * params["s2"][None, :, None, None] + params["b2"][None, :, None, None]
    h = jnp.clip(h, 0.0, 6.0)

    wp = jnp.transpose(params["w_proj_raw"], (1, 0))[:, :, None, None]
    h = lax.conv_general_dilated(h, wp, (1, 1), "VALID",
                                 dimension_numbers=dn, precision=prec)
    h = h * params["s3"][None, :, None, None] + params["b3"][None, :, None, None]

    if use_res_connect:
        h = x_nchw + h
    return h


# ----------------------------------- main ----------------------------------- #

# Tolerance leaves headroom for the MXU's default (bf16-pass) f32 matmul
# precision inside the kernel vs. the HIGHEST-precision XLA reference; genuine
# semantic bugs (padding/stride/bias/residual) produce O(0.1..1) errors.
_TOL = 5e-3


def _run_case(*, inp, oup, stride, expand, N=2, H=16, W=16, seed=0):
    key = jax.random.PRNGKey(seed)
    kx, kp = jax.random.split(key)
    x = jax.random.normal(kx, (N, inp, H, W), jnp.float32)
    params = init_params(kp, inp, oup, expand)

    out = inverted_residual_forward(x, params, inp=inp, oup=oup,
                                    stride=stride, expand_ratio=expand)
    out = jax.block_until_ready(out)
    ref = jax.block_until_ready(
        reference_forward(x, params, inp=inp, oup=oup, stride=stride,
                          expand_ratio=expand))

    np.testing.assert_allclose(np.asarray(out), np.asarray(ref),
                               rtol=_TOL, atol=_TOL)
    Ho = (H - 1) // stride + 1
    Wo = (W - 1) // stride + 1
    assert out.shape == (N, oup, Ho, Wo)


def _run_chained(*, seed=5, N=2, H=16, W=16):
    """Two blocks chained through the NHWC entry point (FeatherNet-style stage)."""
    key = jax.random.PRNGKey(seed)
    kx, kp1, kp2 = jax.random.split(key, 3)
    x = jax.random.normal(kx, (N, 4, H, W), jnp.float32)
    p1 = init_params(kp1, 4, 8, 6)    # stage-opening block: stride 2
    p2 = init_params(kp2, 8, 8, 6)    # in-stage block: stride 1, residual

    x_nhwc = jnp.transpose(x, (0, 2, 3, 1))
    h = inverted_residual_forward_nhwc(x_nhwc, p1, inp=4, oup=8, stride=2,
                                       expand_ratio=6)
    h = inverted_residual_forward_nhwc(h, p2, inp=8, oup=8, stride=1,
                                       expand_ratio=6)
    out = jax.block_until_ready(jnp.transpose(h, (0, 3, 1, 2)))

    ref = reference_forward(x, p1, inp=4, oup=8, stride=2, expand_ratio=6)
    ref = jax.block_until_ready(
        reference_forward(ref, p2, inp=8, oup=8, stride=1, expand_ratio=6))
    np.testing.assert_allclose(np.asarray(out), np.asarray(ref),
                               rtol=2 * _TOL, atol=2 * _TOL)
    assert out.shape == (N, 8, H // 2, W // 2)


if __name__ == "__main__":
    # use_res_connect path (stride=1, inp==oup), hidden_dim = 24
    _run_case(inp=4, oup=4, stride=1, expand=6, seed=0)
    # non-residual path (inp != oup)
    _run_case(inp=4, oup=8, stride=1, expand=6, seed=1)
    # expand_ratio == 1 path (no 1x1 expand conv)
    _run_case(inp=8, oup=8, stride=1, expand=1, seed=2)
    # stage-opening stride-2 block (FeatherNet t=6 stages)
    _run_case(inp=4, oup=8, stride=2, expand=6, seed=3)
    # first-stage style block (t=1, stride=2; no residual despite inp==oup)
    _run_case(inp=8, oup=8, stride=2, expand=1, seed=4)
    # two blocks chained via the NHWC boundary (no intermediate transposes)
    _run_chained(seed=5)
    print("KERNEL_OK")
</pallas_src>

<mosaic_0001>
module attributes {stable_mosaic.version = 11 : i64} {
  func.func @_ir_kernel(%arg0: i32, %arg1: memref<256x4xf32, #tpu.memory_space<vmem>>, %arg2: memref<4x24xf32, #tpu.memory_space<vmem>>, %arg3: memref<1x24xf32, #tpu.memory_space<vmem>>, %arg4: memref<3x3x24xf32, #tpu.memory_space<vmem>>, %arg5: memref<1x24xf32, #tpu.memory_space<vmem>>, %arg6: memref<24x4xf32, #tpu.memory_space<vmem>>, %arg7: memref<1x4xf32, #tpu.memory_space<vmem>>, %arg8: memref<256x4xf32, #tpu.memory_space<vmem>>, %arg9: memref<18x18x24xf32, #tpu.memory_space<vmem>>) attributes {dimension_semantics = [#tpu.dimension_semantics<parallel>], iteration_bounds = array<i64: 2>, scalar_prefetch = 0 : i64, scratch_operands = 1 : i64, tpu.core_type = #tpu.core_type<tc>, window_params = [{transform_indices = @transform_0, window_bounds = array<i64: 256, 4>}, {pipeline_mode = #tpu.pipeline_mode<synchronous>, transform_indices = @transform_1, window_bounds = array<i64: 4, 24>}, {pipeline_mode = #tpu.pipeline_mode<synchronous>, transform_indices = @transform_2, window_bounds = array<i64: 1, 24>}, {pipeline_mode = #tpu.pipeline_mode<synchronous>, transform_indices = @transform_3, window_bounds = array<i64: 3, 3, 24>}, {pipeline_mode = #tpu.pipeline_mode<synchronous>, transform_indices = @transform_4, window_bounds = array<i64: 1, 24>}, {pipeline_mode = #tpu.pipeline_mode<synchronous>, transform_indices = @transform_5, window_bounds = array<i64: 24, 4>}, {pipeline_mode = #tpu.pipeline_mode<synchronous>, transform_indices = @transform_6, window_bounds = array<i64: 1, 4>}, {transform_indices = @transform_7, window_bounds = array<i64: 256, 4>}]} {
    %c0 = arith.constant 0 : index
    %c0_0 = arith.constant 0 : index
    %0 = vector.load %arg1[%c0, %c0_0] : memref<256x4xf32, #tpu.memory_space<vmem>>, vector<256x4xf32>
    %c0_1 = arith.constant 0 : index
    %c0_2 = arith.constant 0 : index
    %1 = vector.load %arg2[%c0_1, %c0_2] : memref<4x24xf32, #tpu.memory_space<vmem>>, vector<4x24xf32>
    %cst = arith.constant dense<0.000000e+00> : vector<256x24xf32>
    %2 = tpu.matmul %0, %1, %cst {dimension_numbers = #tpu.dot_dimension_numbers<[1], [0], [0], [1], [0, 0, 1, 1], [], []>} : vector<256x4xf32>, vector<4x24xf32>, vector<256x24xf32> -> vector<256x24xf32>
    %c0_3 = arith.constant 0 : index
    %c0_4 = arith.constant 0 : index
    %3 = vector.load %arg3[%c0_3, %c0_4] : memref<1x24xf32, #tpu.memory_space<vmem>>, vector<1x24xf32>
    %4 = vector.broadcast %3 : vector<1x24xf32> to vector<256x24xf32>
    %5 = arith.addf %2, %4 : vector<256x24xf32>
    %cst_5 = arith.constant 0.000000e+00 : f32
    %cst_6 = arith.constant 6.000000e+00 : f32
    %6 = vector.broadcast %cst_5 : f32 to vector<256x24xf32>
    %7 = arith.maximumf %6, %5 : vector<256x24xf32>
    %8 = vector.broadcast %cst_6 : f32 to vector<256x24xf32>
    %9 = arith.minimumf %8, %7 : vector<256x24xf32>
    %cst_7 = arith.constant 0.000000e+00 : f32
    %10 = vector.broadcast %cst_7 : f32 to vector<18x18x24xf32>
    %c0_8 = arith.constant 0 : index
    %c0_9 = arith.constant 0 : index
    %c0_10 = arith.constant 0 : index
    %11 = vector.load %arg9[%c0_8, %c0_9, %c0_10] : memref<18x18x24xf32, #tpu.memory_space<vmem>>, vector<18x18x24xf32>
    tpu.vector_store %arg9[%c0_8, %c0_9, %c0_10], %10 {strides = array<i32>} : memref<18x18x24xf32, #tpu.memory_space<vmem>>, vector<18x18x24xf32>,
    %12 = vector.shape_cast %9 : vector<256x24xf32> to vector<16x16x24xf32>
    %c1 = arith.constant 1 : index
    %c1_11 = arith.constant 1 : index
    %c0_12 = arith.constant 0 : index
    %13 = vector.load %arg9[%c1, %c1_11, %c0_12] : memref<18x18x24xf32, #tpu.memory_space<vmem>>, vector<16x16x24xf32>
    tpu.vector_store %arg9[%c1, %c1_11, %c0_12], %12 {strides = array<i32>} : memref<18x18x24xf32, #tpu.memory_space<vmem>>, vector<16x16x24xf32>,
    %c0_13 = arith.constant 0 : index
    %c0_14 = arith.constant 0 : index
    %c0_15 = arith.constant 0 : index
    %14 = vector.load %arg4[%c0_13, %c0_14, %c0_15] : memref<3x3x24xf32, #tpu.memory_space<vmem>>, vector<3x3x24xf32>
    %cst_16 = arith.constant 0.000000e+00 : f32
    %15 = vector.broadcast %cst_16 : f32 to vector<16x16x24xf32>
    %c0_17 = arith.constant 0 : index
    %c0_18 = arith.constant 0 : index
    %c0_19 = arith.constant 0 : index
    %16 = vector.load %arg9[%c0_17, %c0_18, %c0_19] : memref<18x18x24xf32, #tpu.memory_space<vmem>>, vector<16x16x24xf32>
    %17 = vector.extract_strided_slice %14 {offsets = [0, 0, 0], sizes = [1, 1, 24], strides = [1, 1, 1]} : vector<3x3x24xf32> to vector<1x1x24xf32>
    %18 = vector.shape_cast %17 : vector<1x1x24xf32> to vector<24xf32>
    %19 = vector.shape_cast %18 : vector<24xf32> to vector<1x1x24xf32>
    %20 = vector.broadcast %19 : vector<1x1x24xf32> to vector<16x16x24xf32>
    %21 = arith.mulf %16, %20 : vector<16x16x24xf32>
    %22 = arith.addf %15, %21 : vector<16x16x24xf32>
    %c0_20 = arith.constant 0 : index
    %c1_21 = arith.constant 1 : index
    %c0_22 = arith.constant 0 : index
    %23 = vector.load %arg9[%c0_20, %c1_21, %c0_22] : memref<18x18x24xf32, #tpu.memory_space<vmem>>, vector<16x16x24xf32>
    %24 = vector.extract_strided_slice %14 {offsets = [0, 1, 0], sizes = [1, 1, 24], strides = [1, 1, 1]} : vector<3x3x24xf32> to vector<1x1x24xf32>
    %25 = vector.shape_cast %24 : vector<1x1x24xf32> to vector<24xf32>
    %26 = vector.shape_cast %25 : vector<24xf32> to vector<1x1x24xf32>
    %27 = vector.broadcast %26 : vector<1x1x24xf32> to vector<16x16x24xf32>
    %28 = arith.mulf %23, %27 : vector<16x16x24xf32>
    %29 = arith.addf %22, %28 : vector<16x16x24xf32>
    %c0_23 = arith.constant 0 : index
    %c2 = arith.constant 2 : index
    %c0_24 = arith.constant 0 : index
    %30 = vector.load %arg9[%c0_23, %c2, %c0_24] : memref<18x18x24xf32, #tpu.memory_space<vmem>>, vector<16x16x24xf32>
    %31 = vector.extract_strided_slice %14 {offsets = [0, 2, 0], sizes = [1, 1, 24], strides = [1, 1, 1]} : vector<3x3x24xf32> to vector<1x1x24xf32>
    %32 = vector.shape_cast %31 : vector<1x1x24xf32> to vector<24xf32>
    %33 = vector.shape_cast %32 : vector<24xf32> to vector<1x1x24xf32>
    %34 = vector.broadcast %33 : vector<1x1x24xf32> to vector<16x16x24xf32>
    %35 = arith.mulf %30, %34 : vector<16x16x24xf32>
    %36 = arith.addf %29, %35 : vector<16x16x24xf32>
    %c1_25 = arith.constant 1 : index
    %c0_26 = arith.constant 0 : index
    %c0_27 = arith.constant 0 : index
    %37 = vector.load %arg9[%c1_25, %c0_26, %c0_27] : memref<18x18x24xf32, #tpu.memory_space<vmem>>, vector<16x16x24xf32>
    %38 = vector.extract_strided_slice %14 {offsets = [1, 0, 0], sizes = [1, 1, 24], strides = [1, 1, 1]} : vector<3x3x24xf32> to vector<1x1x24xf32>
    %39 = vector.shape_cast %38 : vector<1x1x24xf32> to vector<24xf32>
    %40 = vector.shape_cast %39 : vector<24xf32> to vector<1x1x24xf32>
    %41 = vector.broadcast %40 : vector<1x1x24xf32> to vector<16x16x24xf32>
    %42 = arith.mulf %37, %41 : vector<16x16x24xf32>
    %43 = arith.addf %36, %42 : vector<16x16x24xf32>
    %c1_28 = arith.constant 1 : index
    %c1_29 = arith.constant 1 : index
    %c0_30 = arith.constant 0 : index
    %44 = vector.load %arg9[%c1_28, %c1_29, %c0_30] : memref<18x18x24xf32, #tpu.memory_space<vmem>>, vector<16x16x24xf32>
    %45 = vector.extract_strided_slice %14 {offsets = [1, 1, 0], sizes = [1, 1, 24], strides = [1, 1, 1]} : vector<3x3x24xf32> to vector<1x1x24xf32>
    %46 = vector.shape_cast %45 : vector<1x1x24xf32> to vector<24xf32>
    %47 = vector.shape_cast %46 : vector<24xf32> to vector<1x1x24xf32>
    %48 = vector.broadcast %47 : vector<1x1x24xf32> to vector<16x16x24xf32>
    %49 = arith.mulf %44, %48 : vector<16x16x24xf32>
    %50 = arith.addf %43, %49 : vector<16x16x24xf32>
    %c1_31 = arith.constant 1 : index
    %c2_32 = arith.constant 2 : index
    %c0_33 = arith.constant 0 : index
    %51 = vector.load %arg9[%c1_31, %c2_32, %c0_33] : memref<18x18x24xf32, #tpu.memory_space<vmem>>, vector<16x16x24xf32>
    %52 = vector.extract_strided_slice %14 {offsets = [1, 2, 0], sizes = [1, 1, 24], strides = [1, 1, 1]} : vector<3x3x24xf32> to vector<1x1x24xf32>
    %53 = vector.shape_cast %52 : vector<1x1x24xf32> to vector<24xf32>
    %54 = vector.shape_cast %53 : vector<24xf32> to vector<1x1x24xf32>
    %55 = vector.broadcast %54 : vector<1x1x24xf32> to vector<16x16x24xf32>
    %56 = arith.mulf %51, %55 : vector<16x16x24xf32>
    %57 = arith.addf %50, %56 : vector<16x16x24xf32>
    %c2_34 = arith.constant 2 : index
    %c0_35 = arith.constant 0 : index
    %c0_36 = arith.constant 0 : index
    %58 = vector.load %arg9[%c2_34, %c0_35, %c0_36] : memref<18x18x24xf32, #tpu.memory_space<vmem>>, vector<16x16x24xf32>
    %59 = vector.extract_strided_slice %14 {offsets = [2, 0, 0], sizes = [1, 1, 24], strides = [1, 1, 1]} : vector<3x3x24xf32> to vector<1x1x24xf32>
    %60 = vector.shape_cast %59 : vector<1x1x24xf32> to vector<24xf32>
    %61 = vector.shape_cast %60 : vector<24xf32> to vector<1x1x24xf32>
    %62 = vector.broadcast %61 : vector<1x1x24xf32> to vector<16x16x24xf32>
    %63 = arith.mulf %58, %62 : vector<16x16x24xf32>
    %64 = arith.addf %57, %63 : vector<16x16x24xf32>
    %c2_37 = arith.constant 2 : index
    %c1_38 = arith.constant 1 : index
    %c0_39 = arith.constant 0 : index
    %65 = vector.load %arg9[%c2_37, %c1_38, %c0_39] : memref<18x18x24xf32, #tpu.memory_space<vmem>>, vector<16x16x24xf32>
    %66 = vector.extract_strided_slice %14 {offsets = [2, 1, 0], sizes = [1, 1, 24], strides = [1, 1, 1]} : vector<3x3x24xf32> to vector<1x1x24xf32>
    %67 = vector.shape_cast %66 : vector<1x1x24xf32> to vector<24xf32>
    %68 = vector.shape_cast %67 : vector<24xf32> to vector<1x1x24xf32>
    %69 = vector.broadcast %68 : vector<1x1x24xf32> to vector<16x16x24xf32>
    %70 = arith.mulf %65, %69 : vector<16x16x24xf32>
    %71 = arith.addf %64, %70 : vector<16x16x24xf32>
    %c2_40 = arith.constant 2 : index
    %c2_41 = arith.constant 2 : index
    %c0_42 = arith.constant 0 : index
    %72 = vector.load %arg9[%c2_40, %c2_41, %c0_42] : memref<18x18x24xf32, #tpu.memory_space<vmem>>, vector<16x16x24xf32>
    %73 = vector.extract_strided_slice %14 {offsets = [2, 2, 0], sizes = [1, 1, 24], strides = [1, 1, 1]} : vector<3x3x24xf32> to vector<1x1x24xf32>
    %74 = vector.shape_cast %73 : vector<1x1x24xf32> to vector<24xf32>
    %75 = vector.shape_cast %74 : vector<24xf32> to vector<1x1x24xf32>
    %76 = vector.broadcast %75 : vector<1x1x24xf32> to vector<16x16x24xf32>
    %77 = arith.mulf %72, %76 : vector<16x16x24xf32>
    %78 = arith.addf %71, %77 : vector<16x16x24xf32>
    %c0_43 = arith.constant 0 : index
    %c0_44 = arith.constant 0 : index
    %79 = vector.load %arg5[%c0_43, %c0_44] : memref<1x24xf32, #tpu.memory_space<vmem>>, vector<1x24xf32>
    %80 = vector.shape_cast %79 : vector<1x24xf32> to vector<1x1x24xf32>
    %81 = vector.broadcast %80 : vector<1x1x24xf32> to vector<16x16x24xf32>
    %82 = arith.addf %78, %81 : vector<16x16x24xf32>
    %cst_45 = arith.constant 0.000000e+00 : f32
    %cst_46 = arith.constant 6.000000e+00 : f32
    %83 = vector.broadcast %cst_45 : f32 to vector<16x16x24xf32>
    %84 = arith.maximumf %83, %82 : vector<16x16x24xf32>
    %85 = vector.broadcast %cst_46 : f32 to vector<16x16x24xf32>
    %86 = arith.minimumf %85, %84 : vector<16x16x24xf32>
    %87 = vector.shape_cast %86 : vector<16x16x24xf32> to vector<256x24xf32>
    %c0_47 = arith.constant 0 : index
    %c0_48 = arith.constant 0 : index
    %88 = vector.load %arg6[%c0_47, %c0_48] : memref<24x4xf32, #tpu.memory_space<vmem>>, vector<24x4xf32>
    %cst_49 = arith.constant dense<0.000000e+00> : vector<256x4xf32>
    %89 = tpu.matmul %87, %88, %cst_49 {dimension_numbers = #tpu.dot_dimension_numbers<[1], [0], [0], [1], [0, 0, 1, 1], [], []>} : vector<256x24xf32>, vector<24x4xf32>, vector<256x4xf32> -> vector<256x4xf32>
    %c0_50 = arith.constant 0 : index
    %c0_51 = arith.constant 0 : index
    %90 = vector.load %arg7[%c0_50, %c0_51] : memref<1x4xf32, #tpu.memory_space<vmem>>, vector<1x4xf32>
    %91 = vector.broadcast %90 : vector<1x4xf32> to vector<256x4xf32>
    %92 = arith.addf %89, %91 : vector<256x4xf32>
    %93 = arith.addf %92, %0 : vector<256x4xf32>
    %c0_52 = arith.constant 0 : index
    %c0_53 = arith.constant 0 : index
    %94 = vector.load %arg8[%c0_52, %c0_53] : memref<256x4xf32, #tpu.memory_space<vmem>>, vector<256x4xf32>
    tpu.vector_store %arg8[%c0_52, %c0_53], %93 {strides = array<i32>} : memref<256x4xf32, #tpu.memory_space<vmem>>, vector<256x4xf32>,
    return
  }
  func.func @transform_0(%arg0: i32) -> (i32, i32) {
    %c0_i32 = arith.constant 0 : i32
    %c0_i32_0 = arith.constant 0 : i32
    return %arg0, %c0_i32 : i32, i32
  }
  func.func @transform_1(%arg0: i32) -> (i32, i32) {
    %c0_i32 = arith.constant 0 : i32
    %c0_i32_0 = arith.constant 0 : i32
    %c0_i32_1 = arith.constant 0 : i32
    return %c0_i32, %c0_i32_0 : i32, i32
  }
  func.func @transform_2(%arg0: i32) -> (i32, i32) {
    %c0_i32 = arith.constant 0 : i32
    %c0_i32_0 = arith.constant 0 : i32
    %c0_i32_1 = arith.constant 0 : i32
    return %c0_i32, %c0_i32_0 : i32, i32
  }
  func.func @transform_3(%arg0: i32) -> (i32, i32, i32) {
    %c0_i32 = arith.constant 0 : i32
    %c0_i32_0 = arith.constant 0 : i32
    %c0_i32_1 = arith.constant 0 : i32
    %c0_i32_2 = arith.constant 0 : i32
    return %c0_i32, %c0_i32_0, %c0_i32_1 : i32, i32, i32
  }
  func.func @transform_4(%arg0: i32) -> (i32, i32) {
    %c0_i32 = arith.constant 0 : i32
    %c0_i32_0 = arith.constant 0 : i32
    %c0_i32_1 = arith.constant 0 : i32
    return %c0_i32, %c0_i32_0 : i32, i32
  }
  func.func @transform_5(%arg0: i32) -> (i32, i32) {
    %c0_i32 = arith.constant 0 : i32
    %c0_i32_0 = arith.constant 0 : i32
    %c0_i32_1 = arith.constant 0 : i32
    return %c0_i32, %c0_i32_0 : i32, i32
  }
  func.func @transform_6(%arg0: i32) -> (i32, i32) {
    %c0_i32 = arith.constant 0 : i32
    %c0_i32_0 = arith.constant 0 : i32
    %c0_i32_1 = arith.constant 0 : i32
    return %c0_i32, %c0_i32_0 : i32, i32
  }
  func.func @transform_7(%arg0: i32) -> (i32, i32) {
    %c0_i32 = arith.constant 0 : i32
    %c0_i32_0 = arith.constant 0 : i32
    return %arg0, %c0_i32 : i32, i32
  }
}

</mosaic_0001>

<bundles_post_ra>
// kernel: tpu_custom_call.1
= control target key start
LH: loop header
LB: loop body
LE: loop exit
PB: predicated region body
PF: predicated region fallthrough
CT: control target
= control target key end

     0   :  { %s2174_s24 = smov 0   ;;  %s3170_s0 = inlined_call_operand.vmem [shape: f32[512,4], index: 0, kind: input, shape index: {}]   ;;  %s3171_s1 = inlined_call_operand.vmem [shape: f32[4,24], index: 1, kind: input, shape index: {}]   ;;  %s3172_s2 = inlined_call_operand.vmem [shape: f32[1,24], index: 2, kind: input, shape index: {}]   ;;  %s3173_s3 = inlined_call_operand.vmem [shape: f32[3,3,24], index: 3, kind: input, shape index: {}]   ;;  %s3174_s4 = inlined_call_operand.vmem [shape: f32[1,24], index: 4, kind: input, shape index: {}]   ;;  %s3175_s5 = inlined_call_operand.vmem [shape: f32[24,4], index: 5, kind: input, shape index: {}]   ;;  %s3176_s6 = inlined_call_operand.vmem [shape: f32[1,4], index: 6, kind: input, shape index: {}]   ;;  %s3177_s7 = inlined_call_operand.vmem [shape: f32[512,4], index: 7, kind: output, shape index: {}]  }
   0x1 LB: > { %s1999_s25 = sadd.s32 4294967295, %s2131_s24   ;;  %p2003_p0 = scmp.ge.s32.totalorder %s2131_s24, 1  ;;  %s2131_s24 = sphi %s2174_s24, %s17_s24  }
   0x2   : > { %p238_p1 = scmp.lt.s32.totalorder %s2131_s24, 3 }
   0x4   : > { %p239_p2 = pnand %p2003_p0, %p238_p1 }
   0x5   : > { %s2004_s28 = sshll.u32 (!%p239_p2), %s1999_s25, 5 }
   0x6   : > { %242 = sbr.rel (%p239_p2) target bundleno = 560 (0x230), region = 48  ;;  %p271_p3 = scmp.lt.s32.totalorder (!%p239_p2), %s2004_s28, 63 }
   0xb   : > { %v314_v0 = vld [vmem:[%s3171_s1] sm:$0xf]  ;;  %vm416_vm0 = vcmask 1043456   ;;  %s3179_s28 = smov (!%p271_p3, %s2004_s28), 63  ;;  %vm319_vm1 = vcmask 31744   ;;  %vm597_vm2 = vcmask 195584  }
   0xc   : > { %2008 = vmatpush.msk.msra.mxu0 %vm416_vm0, %v314_v0  ;;  %2075 = vmatpush.msk.msra.mxu3 %vm416_vm0, %v314_v0  ;;  %s2005_s29 = sshll.u32 %s3179_s28, 3  ;;  %v2133_v20 = vmov 0.0   ;;  %v2299_v27 = vld [vmem:[%s3172_s2] ss:$0 sm:$0xff]  ;;  %vm600_vm3 = vcmask 189440   ;;  %v1665_v44 = vld [vmem:[%s3175_s5 + $0x10] sm:$0xff] }
   0xd   : > { %s2193_s9 = scalar_lea.vmem %s3170_s0, %s2005_s29  ;;  %602 = vst.msk [vmem:[#allocation2 + $0x18] sm:$0xff] %vm597_vm2, %v2133_v20  ;;  %v686_v36 = vld [vmem:[%s3173_s3] sm:$0x7]  ;;  %v1664_v45 = vld [vmem:[%s3175_s5 + $0x8] sm:$0xff]  ;;  %1779 = vmatpush.msra.mxu1 %v1665_v44  ;;  %2076 = vmatpush.msra.mxu2 %v1665_v44  ;;  %v687_v53 = vld [vmem:[%s3173_s3 + $0x4] sm:$0x7]  ;;  %s2905_s15 = scalar_lea.vmem %s3177_s7, %s2005_s29 }
   0xe   : > { %v282_v1 = vld [vmem:[%s2193_s9] sm:$0xff]  ;;  %v283_v2 = vld [vmem:[%s2193_s9 + $0x8] sm:$0xff]  ;;  %v284_v3 = vld [vmem:[%s2193_s9 + $0x10] sm:$0xff]  ;;  %603 = vst.msk [vmem:[#allocation2 + $0x20] sm:$0xff] %vm597_vm2, %v2133_v20  ;;  %v2346_v40 = vperm.slane %v686_v36, 0  ;;  %v2348_v41 = vperm.slane %v686_v36, 1 }
   0xf   : > { %2009 = vmatmul.msk.f32.vlgmr.msra.gmra.mxu0 %vm319_vm1, %v282_v1  ;;  %v285_v4 = vld [vmem:[%s2193_s9 + $0x18] sm:$0xff]  ;;  %v286_v5 = vld [vmem:[%s2193_s9 + $0x20] sm:$0xff]  ;;  %v287_v6 = vld [vmem:[%s2193_s9 + $0x28] sm:$0xff]  ;;  %598 = vst.msk [vmem:[#allocation2] sm:$0xff] %vm597_vm2, %v2133_v20  ;;  %v2366_v52 = vperm.slane %v686_v36, 2  ;;  %1780 = vmatpush.msra.mxu1 %v1664_v45  ;;  %v2387_v63 = vperm.slane %v687_v53, 0 }
  0x10   : > { %v288_v7 = vld [vmem:[%s2193_s9 + $0x30] sm:$0xff]  ;;  %v299_v8 = vld [vmem:[%s2193_s9 + $0x88] sm:$0xff]  ;;  %v289_v9 = vld [vmem:[%s2193_s9 + $0x38] sm:$0xff]  ;;  %599 = vst.msk [vmem:[#allocation2 + $0x8] sm:$0xff] %vm597_vm2, %v2133_v20  ;;  %2077 = vmatpush.msra.mxu2 %v1664_v45 }
  0x11   : > { %2026 = vmatmul.msk.f32.vlgmr.msra.gmra.mxu3 %vm319_vm1, %v299_v8  ;;  %v300_v10 = vld [vmem:[%s2193_s9 + $0x90] sm:$0xff]  ;;  %v290_v11 = vld [vmem:[%s2193_s9 + $0x40] sm:$0xff]  ;;  %v301_v12 = vld [vmem:[%s2193_s9 + $0x98] sm:$0xff]  ;;  %605 = vst.msk [vmem:[#allocation2 + $0x30] sm:$0xff] %vm597_vm2, %v2133_v20 }
  0x12   : > { %v291_v13 = vld [vmem:[%s2193_s9 + $0x48] sm:$0xff]  ;;  %v302_v14 = vld [vmem:[%s2193_s9 + $0xa0] sm:$0xff]  ;;  %v292_v15 = vld [vmem:[%s2193_s9 + $0x50] sm:$0xff]  ;;  %606 = vst.msk [vmem:[#allocation2 + $0x38] sm:$0xff] %vm597_vm2, %v2133_v20 }
  0x13   : > { %v303_v16 = vld [vmem:[%s2193_s9 + $0xa8] sm:$0xff]  ;;  %v293_v17 = vld [vmem:[%s2193_s9 + $0x58] sm:$0xff]  ;;  %v294_v18 = vld [vmem:[%s2193_s9 + $0x60] sm:$0xff]  ;;  %608 = vst.msk [vmem:[#allocation2 + $0x48] sm:$0xff] %vm597_vm2, %v2133_v20 }
  0x14   : > { %v304_v19 = vld [vmem:[%s2193_s9 + $0xb0] sm:$0xff]  ;;  %v295_v21 = vld [vmem:[%s2193_s9 + $0x68] sm:$0xff]  ;;  %v305_v22 = vld [vmem:[%s2193_s9 + $0xb8] sm:$0xff]  ;;  %609 = vst.msk [vmem:[#allocation2 + $0x50] sm:$0xff] %vm597_vm2, %v2133_v20 }
  0x15   : > { %611 = vst.msk [vmem:[#allocation2 + $0x60] sm:$0xff] %vm597_vm2, %v2133_v20  ;;  %v296_v23 = vld [vmem:[%s2193_s9 + $0x70] sm:$0xff]  ;;  %v306_v24 = vld [vmem:[%s2193_s9 + $0xc0] sm:$0xff]  ;;  %v297_v25 = vld [vmem:[%s2193_s9 + $0x78] sm:$0xff] }
  0x16   : > { %612 = vst.msk [vmem:[#allocation2 + $0x68] sm:$0xff] %vm597_vm2, %v2133_v20  ;;  %v307_v26 = vld [vmem:[%s2193_s9 + $0xc8] sm:$0xff]  ;;  %v298_v29 = vld [vmem:[%s2193_s9 + $0x80] sm:$0xff]  ;;  %v308_v32 = vld [vmem:[%s2193_s9 + $0xd0] sm:$0xff] }
  0x17   : > { %2010 = vmatmul.msk.f32.gmra.mxu0 %vm319_vm1, %v283_v2  ;;  %614 = vst.msk [vmem:[#allocation2 + $0x78] sm:$0xff] %vm597_vm2, %v2133_v20  ;;  %v309_v38 = vld [vmem:[%s2193_s9 + $0xd8] sm:$0xff]  ;;  %v689_v42 = vld [vmem:[#allocation2] sm:$0xff]  ;;  %v690_v47 = vld [vmem:[#allocation2 + $0x8] sm:$0xff] }
  0x18   : > { %615 = vst.msk [vmem:[#allocation2 + $0x80] sm:$0xff] %vm597_vm2, %v2133_v20  ;;  %v786_v43 = vld [vmem:[#allocation2 + $0x1] sm:$0xff]  ;;  %v722_v50 = vmul.f32 %v2346_v40, %v689_v42  ;;  %v723_v57 = vmul.f32 %v2346_v40, %v690_v47 }
  0x19   : > { %2027 = vmatmul.msk.f32.gmra.mxu3 %vm319_vm1, %v300_v10  ;;  %617 = vst.msk [vmem:[#allocation2 + $0x90] sm:$0xff] %vm597_vm2, %v2133_v20  ;;  %v819_v51 = vmul.f32 %v2348_v41, %v786_v43  ;;  %v883_v54 = vld [vmem:[#allocation2 + $0x2] sm:$0xff]  ;;  %v312_v43 = vld [vmem:[%s2193_s9 + $0xf0] sm:$0xff] }
  0x1a   : > { %618 = vst.msk [vmem:[#allocation2 + $0x98] sm:$0xff] %vm597_vm2, %v2133_v20  ;;  %v1663_v56 = vld [vmem:[%s3175_s5] sm:$0xff]  ;;  %v916_v62 = vmul.f32 %v2366_v52, %v883_v54 }
  0x1b   : > { %620 = vst.msk [vmem:[#allocation2 + $0xa8] sm:$0xff] %vm597_vm2, %v2133_v20  ;;  %1781 = vmatpush.msra.mxu1 %v1663_v56  ;;  %v310_v59 = vld [vmem:[%s2193_s9 + $0xe0] sm:$0xff]  ;;  %2078 = vmatpush.msra.mxu2 %v1663_v56  ;;  %v851_v61 = vadd.f32 %v819_v51, %v722_v50 }
  0x1c   : > { %621 = vst.msk [vmem:[#allocation2 + $0xb0] sm:$0xff] %vm597_vm2, %v2133_v20 }
  0x1d   : > { %623 = vst.msk [vmem:[#allocation2 + $0xc0] sm:$0xff] %vm597_vm2, %v2133_v20 }
  0x1e   : > { %624 = vst.msk [vmem:[#allocation2 + $0xc8] sm:$0xff] %vm597_vm2, %v2133_v20 }
  0x1f   : > { %2011 = vmatmul.msk.f32.gmra.mxu0 %vm319_vm1, %v284_v3  ;;  %626 = vst.msk [vmem:[#allocation2 + $0xd8] sm:$0xff] %vm597_vm2, %v2133_v20 }
  0x20   : > { %627 = vst.msk [vmem:[#allocation2 + $0xe0] sm:$0xff] %vm597_vm2, %v2133_v20 }
  0x21   : > { %2028 = vmatmul.msk.f32.gmra.mxu3 %vm319_vm1, %v301_v12  ;;  %629 = vst.msk [vmem:[#allocation2 + $0xf0] sm:$0xff] %vm597_vm2, %v2133_v20  ;;  %v2408_v12 = vperm.slane %v687_v53, 2 }
  0x22   : > { %630 = vst.msk [vmem:[#allocation2 + $0xf8] sm:$0xff] %vm597_vm2, %v2133_v20 }
  0x23   : > { %632 = vst.msk [vmem:[#allocation2 + $0x108] sm:$0xff] %vm597_vm2, %v2133_v20 }
  0x24   : > { %633 = vst.msk [vmem:[#allocation2 + $0x110] sm:$0xff] %vm597_vm2, %v2133_v20 }
  0x25   : > { %635 = vst.msk [vmem:[#allocation2 + $0x120] sm:$0xff] %vm597_vm2, %v2133_v20 }
  0x26   : > { %636 = vst.msk [vmem:[#allocation2 + $0x128] sm:$0xff] %vm597_vm2, %v2133_v20 }
  0x27   : > { %2012 = vmatmul.msk.f32.gmra.mxu0 %vm319_vm1, %v285_v4  ;;  %638 = vst.msk [vmem:[#allocation2 + $0x138] sm:$0xff] %vm597_vm2, %v2133_v20 }
  0x28   : > { %639 = vst.msk [vmem:[#allocation2 + $0x140] sm:$0xff] %vm597_vm2, %v2133_v20 }
  0x29   : > { %2029 = vmatmul.msk.f32.gmra.mxu3 %vm319_vm1, %v302_v14  ;;  %641 = vst.msk [vmem:[#allocation2 + $0x150] sm:$0xff] %vm597_vm2, %v2133_v20 }
  0x2a   : > { %642 = vst.msk [vmem:[#allocation2 + $0x158] sm:$0xff] %vm597_vm2, %v2133_v20 }
  0x2b   : > { %644 = vst.msk [vmem:[#allocation2 + $0x168] sm:$0xff] %vm597_vm2, %v2133_v20 }
  0x2c   : > { %645 = vst.msk [vmem:[#allocation2 + $0x170] sm:$0xff] %vm597_vm2, %v2133_v20 }
  0x2d   : > { %647 = vst.msk [vmem:[#allocation2 + $0x180] sm:$0xff] %vm597_vm2, %v2133_v20 }
  0x2e   : > { %648 = vst.msk [vmem:[#allocation2 + $0x188] sm:$0xff] %vm597_vm2, %v2133_v20 }
  0x2f   : > { %2013 = vmatmul.msk.f32.gmra.mxu0 %vm319_vm1, %v286_v5  ;;  %650 = vst.msk [vmem:[#allocation2 + $0x198] sm:$0xff] %vm597_vm2, %v2133_v20 }
  0x30   : > { %651 = vst.msk [vmem:[#allocation2 + $0x1a0] sm:$0xff] %vm597_vm2, %v2133_v20 }
  0x31   : > { %2030 = vmatmul.msk.f32.gmra.mxu3 %vm319_vm1, %v303_v16  ;;  %604 = vst.msk [vmem:[#allocation2 + $0x28] sm:$0x3] %vm600_vm3, %v2133_v20 }
  0x32   : > { %601 = vst.msk [vmem:[#allocation2 + $0x10] sm:$0x3] %vm600_vm3, %v2133_v20 }
  0x33   : > { %607 = vst.msk [vmem:[#allocation2 + $0x40] sm:$0x3] %vm600_vm3, %v2133_v20 }
  0x34   : > { %610 = vst.msk [vmem:[#allocation2 + $0x58] sm:$0x3] %vm600_vm3, %v2133_v20 }
  0x35   : > { %613 = vst.msk [vmem:[#allocation2 + $0x70] sm:$0x3] %vm600_vm3, %v2133_v20 }
  0x36   : > { %616 = vst.msk [vmem:[#allocation2 + $0x88] sm:$0x3] %vm600_vm3, %v2133_v20 }
  0x37   : > { %2014 = vmatmul.msk.f32.gmra.mxu0 %vm319_vm1, %v287_v6  ;;  %619 = vst.msk [vmem:[#allocation2 + $0xa0] sm:$0x3] %vm600_vm3, %v2133_v20 }
  0x38   : > { %622 = vst.msk [vmem:[#allocation2 + $0xb8] sm:$0x3] %vm600_vm3, %v2133_v20 }
  0x39   : > { %2031 = vmatmul.msk.f32.gmra.mxu3 %vm319_vm1, %v304_v19  ;;  %v787_v48 = vld [vmem:[#allocation2 + $0x9] sm:$0xff]  ;;  %625 = vst.msk [vmem:[#allocation2 + $0xd0] sm:$0x3] %vm600_vm3, %v2133_v20 }
  0x3a   : > { %628 = vst.msk [vmem:[#allocation2 + $0xe8] sm:$0x3] %vm600_vm3, %v2133_v20  ;;  %v820_v58 = vmul.f32 %v2348_v41, %v787_v48  ;;  %v884_v60 = vld [vmem:[#allocation2 + $0xa] sm:$0xff] }
  0x3b   : > { %631 = vst.msk [vmem:[#allocation2 + $0x100] sm:$0x3] %vm600_vm3, %v2133_v20  ;;  %v917_v3 = vmul.f32 %v2366_v52, %v884_v60 }
  0x3c   : > { %634 = vst.msk [vmem:[#allocation2 + $0x118] sm:$0x3] %vm600_vm3, %v2133_v20  ;;  %v852_v2 = vadd.f32 %v820_v58, %v723_v57 }
  0x3d   : > { %637 = vst.msk [vmem:[#allocation2 + $0x130] sm:$0x3] %vm600_vm3, %v2133_v20 }
  0x3e   : > { %640 = vst.msk [vmem:[#allocation2 + $0x148] sm:$0x3] %vm600_vm3, %v2133_v20 }
  0x3f   : > { %2015 = vmatmul.msk.f32.gmra.mxu0 %vm319_vm1, %v288_v7  ;;  %643 = vst.msk [vmem:[#allocation2 + $0x160] sm:$0x3] %vm600_vm3, %v2133_v20  ;;  %v948_v7 = vadd.f32 %v916_v62, %v851_v61 }
  0x40   : > { %646 = vst.msk [vmem:[#allocation2 + $0x178] sm:$0x3] %vm600_vm3, %v2133_v20 }
  0x41   : > { %2032 = vmatmul.msk.f32.gmra.mxu3 %vm319_vm1, %v305_v22  ;;  %649 = vst.msk [vmem:[#allocation2 + $0x190] sm:$0x3] %vm600_vm3, %v2133_v20 }
  0x42   : > { %652 = vst.msk [vmem:[#allocation2 + $0x1a8] sm:$0x3] %vm600_vm3, %v2133_v20 }
  0x47   : > { %2016 = vmatmul.msk.f32.gmra.mxu0 %vm319_vm1, %v289_v9  ;;  %v2402_v9 = vperm.slane %v687_v53, 1 }
  0x49   : > { %2033 = vmatmul.msk.f32.gmra.mxu3 %vm319_vm1, %v306_v24 }
  0x4f   : > { %2017 = vmatmul.msk.f32.gmra.mxu0 %vm319_vm1, %v290_v11  ;;  %v688_v11 = vld [vmem:[%s3173_s3 + $0x8] sm:$0x7] }
  0x51   : > { %2034 = vmatmul.msk.f32.gmra.mxu3 %vm319_vm1, %v307_v26 }
  0x57   : > { %2018 = vmatmul.msk.f32.gmra.mxu0 %vm319_vm1, %v291_v13  ;;  %v949_v13 = vadd.f32 %v917_v3, %v852_v2 }
  0x59   : > { %2035 = vmatmul.msk.f32.gmra.mxu3 %vm319_vm1, %v308_v32 }
  0x5f   : > { %2019 = vmatmul.msk.f32.gmra.mxu0 %vm319_vm1, %v292_v15 }
  0x61   : > { %2036 = vmatmul.msk.f32.gmra.mxu3 %vm319_vm1, %v309_v38 }
  0x67   : > { %2020 = vmatmul.msk.f32.gmra.mxu0 %vm319_vm1, %v293_v17  ;;  %v311_v17 = vld [vmem:[%s2193_s9 + $0xe8] sm:$0xff] }
  0x69   : > { %2037 = vmatmul.msk.f32.gmra.mxu3 %vm319_vm1, %v310_v59  ;;  %v2447_v59 = vld [vmem:[%s3174_s4] ss:$0 sm:$0xff] }
  0x6f   : > { %2021 = vmatmul.msk.f32.gmra.mxu0 %vm319_vm1, %v294_v18 }
  0x71   : > { %2038 = vmatmul.msk.f32.gmra.mxu3 %vm319_vm1, %v311_v17 }
  0x77   : > { %2022 = vmatmul.msk.f32.gmra.mxu0 %vm319_vm1, %v295_v21 }
  0x79   : > { %2039 = vmatmul.msk.f32.gmra.mxu3 %vm319_vm1, %v312_v43 }
  0x7f   : > { %2023 = vmatmul.msk.f32.gmra.mxu0 %vm319_vm1, %v296_v23  ;;  %v2416_v23 = vperm.slane %v688_v11, 0 }
  0x87   : > { %2024 = vmatmul.msk.f32.gmra.mxu0 %vm319_vm1, %v297_v25 }
  0x8c   : > { %v437_v28 = vpop.f32.mrf.mxu0 }
  0x8d   : > { %v438_v30 = vadd.f32 %v2299_v27, %v437_v28 }
  0x8f   : > { %v533_v31 = vmax.f32 %v438_v30, 0.0  ;;  %2025 = vmatmul.msk.f32.gmra.mxu0 %vm319_vm1, %v298_v29  ;;  %v2419_v29 = vperm.slane %v688_v11, 1 }
  0x91   : > { %v565_v33 = vmin.f32 %v533_v31, 6.0 }
  0x93   : > { %654 = vst.msk [vmem:[#allocation2 + $0x19] sm:$0xff] %vm597_vm2, %v565_v33  ;;  %v2426_v33 = vperm.slane %v688_v11, 2 }
  0x94   : > { %v440_v34 = vpop.f32.mrf.mxu0 }
  0x95   : > { %v441_v35 = vadd.f32 %v2299_v27, %v440_v34 }
  0x97   : > { %v534_v37 = vmax.f32 %v441_v35, 0.0 }
  0x99   : > { %v566_v39 = vmin.f32 %v534_v37, 6.0 }
  0x9a   : > { %v980_v0 = vld [vmem:[#allocation2 + $0x18] sm:$0xff] }
  0x9b   : > { %655 = vst.msk [vmem:[#allocation2 + $0x21] sm:$0xff] %vm597_vm2, %v566_v39  ;;  %v1013_v8 = vmul.f32 %v2387_v63, %v980_v0  ;;  %v1077_v15 = vld [vmem:[#allocation2 + $0x19] sm:$0xff]  ;;  %v724_v35 = vmul.f32 %v980_v0, %v2346_v40 }
  0x9c   : > { %v443_v46 = vpop.f32.mrf.mxu0  ;;  %v1110_v21 = vmul.f32 %v2402_v9, %v1077_v15  ;;  %v821_v36 = vmul.f32 %v1077_v15, %v2348_v41 }
  0x9d   : > { %v444_v49 = vadd.f32 %v2299_v27, %v443_v46  ;;  %v1045_v19 = vadd.f32 %v1013_v8, %v948_v7 }
  0x9f   : > { %v535_v55 = vmax.f32 %v444_v49, 0.0  ;;  %v1142_v28 = vadd.f32 %v1110_v21, %v1045_v19 }
  0xa1   : > { %v567_v1 = vmin.f32 %v535_v55, 6.0  ;;  %v853_v55 = vadd.f32 %v821_v36, %v724_v35 }
  0xa2   : > { %v981_v5 = vld [vmem:[#allocation2 + $0x20] sm:$0xff] }
  0xa3   : > { %656 = vst.msk [vmem:[#allocation2 + $0x31] sm:$0xff] %vm597_vm2, %v567_v1  ;;  %v1014_v14 = vmul.f32 %v2387_v63, %v981_v5  ;;  %v1174_v16 = vld [vmem:[#allocation2 + $0x1a] sm:$0xff]  ;;  %v1175_v34 = vld [vmem:[#allocation2 + $0x22] sm:$0xff]  ;;  %v725_v45 = vmul.f32 %v981_v5, %v2346_v40 }
  0xa4   : > { %v446_v4 = vpop.f32.mrf.mxu0  ;;  %v1078_v20 = vld [vmem:[#allocation2 + $0x21] sm:$0xff]  ;;  %v1207_v22 = vmul.f32 %v2408_v12, %v1174_v16  ;;  %v918_v44 = vmul.f32 %v1174_v16, %v2366_v52  ;;  %v1208_v50 = vmul.f32 %v2408_v12, %v1175_v34  ;;  %v919_v8 = vmul.f32 %v1175_v34, %v2366_v52 }
  0xa5   : > { %v447_v6 = vadd.f32 %v2299_v27, %v446_v4  ;;  %v1046_v24 = vadd.f32 %v1014_v14, %v949_v13  ;;  %v1111_v30 = vmul.f32 %v2402_v9, %v1078_v20  ;;  %v822_v46 = vmul.f32 %v1078_v20, %v2348_v41 }
  0xa6   : > { %v1239_v38 = vadd.f32 %v1207_v22, %v1142_v28  ;;  %v950_v1 = vadd.f32 %v918_v44, %v853_v55  ;;  %v313_v22 = vld [vmem:[%s2193_s9 + $0xf8] sm:$0xff] }
  0xa7   : > { %v536_v10 = vmax.f32 %v447_v6, 0.0  ;;  %v1143_v42 = vadd.f32 %v1111_v30, %v1046_v24  ;;  %v854_v2 = vadd.f32 %v822_v46, %v725_v45  ;;  %2040 = vmatmul.msk.f32.gmra.mxu3 %vm319_vm1, %v313_v22 }
  0xa9   : > { %v568_v18 = vmin.f32 %v536_v10, 6.0  ;;  %v1240_v60 = vadd.f32 %v1208_v50, %v1143_v42  ;;  %v951_v17 = vadd.f32 %v919_v8, %v854_v2 }
  0xaa   : > { %v2422_v31 = vld [vmem:[#allocation2 + $0x30] sm:$0xff] }
  0xab   : > { %657 = vst.msk [vmem:[#allocation2 + $0x39] sm:$0xff] %vm597_vm2, %v568_v18  ;;  %v2424_v32 = vld [vmem:[#allocation2 + $0x31] sm:$0xff]  ;;  %v1305_v39 = vmul.f32 %v2416_v23, %v2422_v31  ;;  %v1015_v56 = vmul.f32 %v2422_v31, %v2387_v63  ;;  %v726_v43 = vmul.f32 %v2422_v31, %v2346_v40 }
  0xac   : > { %v449_v25 = vpop.f32.mrf.mxu0  ;;  %v1402_v49 = vmul.f32 %v2419_v29, %v2424_v32  ;;  %v1112_v16 = vmul.f32 %v2424_v32, %v2402_v9  ;;  %v823_v44 = vmul.f32 %v2424_v32, %v2348_v41 }
  0xad   : > { %v450_v26 = vadd.f32 %v2299_v27, %v449_v25  ;;  %v1337_v48 = vadd.f32 %v1305_v39, %v1239_v38  ;;  %v1047_v7 = vadd.f32 %v1015_v56, %v950_v1 }
  0xaf   : > { %v537_v37 = vmax.f32 %v450_v26, 0.0  ;;  %v1434_v57 = vadd.f32 %v1402_v49, %v1337_v48  ;;  %v1144_v30 = vadd.f32 %v1112_v16, %v1047_v7 }
  0xb1   : > { %v569_v47 = vmin.f32 %v537_v37, 6.0 }
  0xb2   : > { %v1466_v51 = vld [vmem:[#allocation2 + $0x32] sm:$0xff]  ;;  %v2450_v0 = vld [vmem:[#allocation2 + $0x3a] sm:$0xff] }
  0xb3   : > { %v1273_v53 = vld [vmem:[#allocation2 + $0x38] sm:$0xff]  ;;  %658 = vst.msk [vmem:[#allocation2 + $0x49] sm:$0xff] %vm597_vm2, %v569_v47  ;;  %v1499_v58 = vmul.f32 %v2426_v33, %v1466_v51  ;;  %v1500_v15 = vmul.f32 %v2426_v33, %v2450_v0  ;;  %v1209_v21 = vmul.f32 %v1466_v51, %v2408_v12  ;;  %v1210_v48 = vmul.f32 %v2450_v0, %v2408_v12 }
  0xb4   : > { %v1370_v54 = vld [vmem:[#allocation2 + $0x39] sm:$0xff]  ;;  %v1306_v61 = vmul.f32 %v2416_v23, %v1273_v53  ;;  %v452_v62 = vpop.f32.mrf.mxu0  ;;  %v1016_v10 = vmul.f32 %v1273_v53, %v2387_v63  ;;  %v920_v49 = vmul.f32 %v1466_v51, %v2366_v52  ;;  %v727_v50 = vmul.f32 %v1273_v53, %v2346_v40 }
  0xb5   : > { %v453_v3 = vadd.f32 %v2299_v27, %v452_v62  ;;  %v1531_v4 = vadd.f32 %v1499_v58, %v1434_v57  ;;  %v1403_v6 = vmul.f32 %v2419_v29, %v1370_v54  ;;  %v1113_v36 = vmul.f32 %v1370_v54, %v2402_v9 }
  0xb6   : > { %v1338_v5 = vadd.f32 %v1306_v61, %v1240_v60  ;;  %v1048_v25 = vadd.f32 %v1016_v10, %v951_v17  ;;  %v1241_v38 = vadd.f32 %v1209_v21, %v1144_v30  ;;  %v824_v55 = vmul.f32 %v1370_v54, %v2348_v41 }
  0xb7   : > { %v538_v11 = vmax.f32 %v453_v3, 0.0  ;;  %v1567_v13 = vadd.f32 %v2447_v59, %v1531_v4  ;;  %v855_v61 = vadd.f32 %v823_v44, %v726_v43 }
  0xb8   : > { %v1435_v14 = vadd.f32 %v1403_v6, %v1338_v5  ;;  %v1145_v42 = vadd.f32 %v1113_v36, %v1048_v25  ;;  %v856_v5 = vadd.f32 %v824_v55, %v727_v50 }
  0xb9   : > { %v570_v18 = vmin.f32 %v538_v11, 6.0  ;;  %v1599_v19 = vmax.f32 %v1567_v13, 0.0  ;;  %v952_v4 = vadd.f32 %v920_v49, %v855_v61  ;;  %v921_v13 = vmul.f32 %v2450_v0, %v2366_v52 }
  0xba   : > { %v1532_v20 = vadd.f32 %v1500_v15, %v1435_v14  ;;  %v2463_v24 = vld [vmem:[#allocation2 + $0x48] sm:$0xff]  ;;  %v1242_v58 = vadd.f32 %v1210_v48, %v1145_v42 }
  0xbb   : > { %659 = vst.msk [vmem:[#allocation2 + $0x51] sm:$0xff] %vm597_vm2, %v570_v18  ;;  %v1631_v26 = vmin.f32 %v1599_v19, 6.0  ;;  %v1307_v34 = vmul.f32 %v2416_v23, %v2463_v24  ;;  %v2473_v39 = vld [vmem:[#allocation2 + $0x49] sm:$0xff]  ;;  %v1017_v62 = vmul.f32 %v2463_v24, %v2387_v63  ;;  %v728_v49 = vmul.f32 %v2463_v24, %v2346_v40 }
  0xbc   : > { %v1568_v28 = vadd.f32 %v2447_v59, %v1532_v20  ;;  %v455_v35 = vpop.f32.mrf.mxu0  ;;  %v1404_v57 = vmul.f32 %v2419_v29, %v2473_v39  ;;  %v1114_v19 = vmul.f32 %v2473_v39, %v2402_v9  ;;  %v953_v20 = vadd.f32 %v921_v13, %v856_v5 }
  0xbd   : > { %v456_v37 = vadd.f32 %v2299_v27, %v455_v35  ;;  %2041 = vmatmul.msk.f32.vlgmr.msra.gmra.mxu1 %vm597_vm2, %v1631_v26  ;;  %v1339_v47 = vadd.f32 %v1307_v34, %v1241_v38  ;;  %v1049_v11 = vadd.f32 %v1017_v62, %v952_v4  ;;  %v825_v50 = vmul.f32 %v2473_v39, %v2348_v41 }
  0xbe   : > { %v1600_v46 = vmax.f32 %v1568_v28, 0.0 }
  0xbf   : > { %v539_v45 = vmax.f32 %v456_v37, 0.0  ;;  %v1436_v51 = vadd.f32 %v1404_v57, %v1339_v47  ;;  %v1146_v35 = vadd.f32 %v1114_v19, %v1049_v11  ;;  %v488_v37 = vpop.f32.mrf.mxu3  ;;  %v857_v5 = vadd.f32 %v825_v50, %v728_v49 }
  0xc0   : > { %v1632_v1 = vmin.f32 %v1600_v46, 6.0  ;;  %v489_v43 = vadd.f32 %v2299_v27, %v488_v37 }
  0xc1   : > { %v571_v56 = vmin.f32 %v539_v45, 6.0 }
  0xc2   : > { %v1468_v31 = vld [vmem:[#allocation2 + $0x4a] sm:$0xff]  ;;  %v2491_v3 = vld [vmem:[#allocation2 + $0x52] sm:$0xff]  ;;  %v550_v48 = vmax.f32 %v489_v43, 0.0 }
  0xc3   : > { %v1275_v60 = vld [vmem:[#allocation2 + $0x50] sm:$0xff]  ;;  %660 = vst.msk [vmem:[#allocation2 + $0x61] sm:$0xff] %vm597_vm2, %v571_v56  ;;  %v1501_v53 = vmul.f32 %v2426_v33, %v1468_v31  ;;  %v1502_v18 = vmul.f32 %v2426_v33, %v2491_v3  ;;  %v1211_v26 = vmul.f32 %v1468_v31, %v2408_v12  ;;  %v922_v62 = vmul.f32 %v1468_v31, %v2366_v52 }
  0xc4   : > { %v1372_v32 = vld [vmem:[#allocation2 + $0x51] sm:$0xff]  ;;  %v1308_v54 = vmul.f32 %v2416_v23, %v1275_v60  ;;  %v458_v2 = vpop.f32.mrf.mxu0  ;;  %v1018_v14 = vmul.f32 %v1275_v60, %v2387_v63  ;;  %v582_v61 = vmin.f32 %v550_v48, 6.0 }
  0xc5   : > { %v459_v6 = vadd.f32 %v2299_v27, %v458_v2  ;;  %2042 = vmatmul.msk.f32.gmra.mxu1 %vm597_vm2, %v1632_v1  ;;  %v1533_v7 = vadd.f32 %v1501_v53, %v1436_v51  ;;  %v1405_v10 = vmul.f32 %v2419_v29, %v1372_v32  ;;  %v1115_v42 = vmul.f32 %v1372_v32, %v2402_v9 }
  0xc6   : > { %v1340_v8 = vadd.f32 %v1308_v54, %v1242_v58  ;;  %v1050_v0 = vadd.f32 %v1018_v14, %v953_v20  ;;  %v1243_v45 = vadd.f32 %v1211_v26, %v1146_v35  ;;  %v1212_v58 = vmul.f32 %v2491_v3, %v2408_v12  ;;  %671 = vst.msk [vmem:[#allocation2 + $0xe1] sm:$0xff] %vm597_vm2, %v582_v61 }
  0xc7   : > { %v540_v15 = vmax.f32 %v459_v6, 0.0  ;;  %v1569_v16 = vadd.f32 %v2447_v59, %v1533_v7  ;;  %v729_v1 = vmul.f32 %v1275_v60, %v2346_v40  ;;  %v826_v51 = vmul.f32 %v1372_v32, %v2348_v41 }
  0xc8   : > { %v1437_v17 = vadd.f32 %v1405_v10, %v1340_v8  ;;  %v1147_v47 = vadd.f32 %v1115_v42, %v1050_v0  ;;  %v491_v8 = vpop.f32.mrf.mxu3  ;;  %v954_v13 = vadd.f32 %v922_v62, %v857_v5 }
  0xc9   : > { %v572_v21 = vmin.f32 %v540_v15, 6.0  ;;  %v1601_v22 = vmax.f32 %v1569_v16, 0.0  ;;  %v492_v14 = vadd.f32 %v2299_v27, %v491_v8  ;;  %v858_v15 = vadd.f32 %v826_v51, %v729_v1 }
  0xca   : > { %v1534_v25 = vadd.f32 %v1502_v18, %v1437_v17  ;;  %v2505_v28 = vld [vmem:[#allocation2 + $0x60] sm:$0xff]  ;;  %v1244_v39 = vadd.f32 %v1212_v58, %v1147_v47 }
  0xcb   : > { %661 = vst.msk [vmem:[#allocation2 + $0x69] sm:$0xff] %vm597_vm2, %v572_v21  ;;  %v1633_v30 = vmin.f32 %v1601_v22, 6.0  ;;  %v1309_v36 = vmul.f32 %v2416_v23, %v2505_v28  ;;  %v2515_v46 = vld [vmem:[#allocation2 + $0x61] sm:$0xff]  ;;  %v1019_v6 = vmul.f32 %v2505_v28, %v2387_v63  ;;  %v551_v21 = vmax.f32 %v492_v14, 0.0 }
  0xcc   : > { %v1570_v34 = vadd.f32 %v2447_v59, %v1534_v25  ;;  %v461_v38 = vpop.f32.mrf.mxu0  ;;  %v1406_v24 = vmul.f32 %v2419_v29, %v2515_v46  ;;  %v923_v22 = vmul.f32 %v2491_v3, %v2366_v52  ;;  %v1116_v35 = vmul.f32 %v2515_v46, %v2402_v9 }
  0xcd   : > { %v462_v44 = vadd.f32 %v2299_v27, %v461_v38  ;;  %2043 = vmatmul.msk.f32.gmra.mxu1 %vm597_vm2, %v1633_v30  ;;  %v1341_v57 = vadd.f32 %v1309_v36, %v1243_v45  ;;  %v1051_v20 = vadd.f32 %v1019_v6, %v954_v13  ;;  %v583_v36 = vmin.f32 %v551_v21, 6.0 }
  0xce   : > { %v1602_v56 = vmax.f32 %v1570_v34, 0.0  ;;  %v955_v37 = vadd.f32 %v923_v22, %v858_v15 }
  0xcf   : > { %v541_v55 = vmax.f32 %v462_v44, 0.0  ;;  %v1438_v60 = vadd.f32 %v1406_v24, %v1341_v57  ;;  %672 = vst.msk [vmem:[#allocation2 + $0xf1] sm:$0xff] %vm597_vm2, %v583_v36  ;;  %v1148_v49 = vadd.f32 %v1116_v35, %v1051_v20  ;;  %v730_v24 = vmul.f32 %v2505_v28, %v2346_v40 }
  0xd0   : > { %v1634_v31 = vmin.f32 %v1602_v56, 6.0 }
  0xd1   : > { %v573_v53 = vmin.f32 %v541_v55, 6.0  ;;  %v494_v55 = vpop.f32.mrf.mxu3 }
  0xd2   : > { %v2528_v54 = vld [vmem:[#allocation2 + $0x62] sm:$0xff]  ;;  %v2537_v11 = vld [vmem:[#allocation2 + $0x6a] sm:$0xff]  ;;  %v495_v58 = vadd.f32 %v2299_v27, %v494_v55 }
  0xd3   : > { %v1277_v2 = vld [vmem:[#allocation2 + $0x68] sm:$0xff]  ;;  %662 = vst.msk [vmem:[#allocation2 + $0x79] sm:$0xff] %vm597_vm2, %v573_v53  ;;  %v1503_v32 = vmul.f32 %v2426_v33, %v2528_v54  ;;  %v1504_v34 = vmul.f32 %v2426_v33, %v2537_v11  ;;  %v1213_v3 = vmul.f32 %v2528_v54, %v2408_v12 }
  0xd4   : > { %v1374_v4 = vld [vmem:[#allocation2 + $0x69] sm:$0xff]  ;;  %v1310_v7 = vmul.f32 %v2416_v23, %v1277_v2  ;;  %v464_v10 = vpop.f32.mrf.mxu0  ;;  %v1020_v25 = vmul.f32 %v1277_v2, %v2387_v63  ;;  %v552_v53 = vmax.f32 %v495_v58, 0.0  ;;  %v731_v8 = vmul.f32 %v1277_v2, %v2346_v40 }
  0xd5   : > { %v465_v16 = vadd.f32 %v2299_v27, %v464_v10  ;;  %2044 = vmatmul.msk.f32.gmra.mxu1 %vm597_vm2, %v1634_v31  ;;  %v1535_v17 = vadd.f32 %v1503_v32, %v1438_v60  ;;  %v1407_v19 = vmul.f32 %v2419_v29, %v1374_v4  ;;  %v1117_v57 = vmul.f32 %v1374_v4, %v2402_v9 }
  0xd6   : > { %v1342_v18 = vadd.f32 %v1310_v7, %v1244_v39  ;;  %v1052_v45 = vadd.f32 %v1020_v25, %v955_v37  ;;  %v1245_v62 = vadd.f32 %v1213_v3, %v1148_v49  ;;  %v827_v39 = vmul.f32 %v2515_v46, %v2348_v41 }
  0xd7   : > { %v542_v26 = vmax.f32 %v465_v16, 0.0  ;;  %v1571_v0 = vadd.f32 %v2447_v59, %v1535_v17  ;;  %v1214_v60 = vmul.f32 %v2537_v11, %v2408_v12  ;;  %v584_v32 = vmin.f32 %v552_v53, 6.0 }
  0xd8   : > { %v1439_v30 = vadd.f32 %v1407_v19, %v1342_v18  ;;  %v1149_v51 = vadd.f32 %v1117_v57, %v1052_v45  ;;  %v924_v7 = vmul.f32 %v2528_v54, %v2366_v52  ;;  %v828_v10 = vmul.f32 %v1374_v4, %v2348_v41 }
  0xd9   : > { %v574_v38 = vmin.f32 %v542_v26, 6.0  ;;  %v1603_v42 = vmax.f32 %v1571_v0, 0.0  ;;  %673 = vst.msk [vmem:[#allocation2 + $0xf9] sm:$0xff] %vm597_vm2, %v584_v32  ;;  %v859_v17 = vadd.f32 %v827_v39, %v730_v24  ;;  %v497_v20 = vpop.f32.mrf.mxu3 }
  0xda   : > { %v1536_v43 = vadd.f32 %v1504_v34, %v1439_v30  ;;  %v2553_v44 = vld [vmem:[#allocation2 + $0x78] sm:$0xff]  ;;  %v1246_v46 = vadd.f32 %v1214_v60, %v1149_v51  ;;  %v498_v26 = vadd.f32 %v2299_v27, %v497_v20  ;;  %v860_v0 = vadd.f32 %v828_v10, %v731_v8 }
  0xdb   : > { %663 = vst.msk [vmem:[#allocation2 + $0x81] sm:$0xff] %vm597_vm2, %v574_v38  ;;  %v1635_v47 = vmin.f32 %v1603_v42, 6.0  ;;  %v1311_v50 = vmul.f32 %v2416_v23, %v2553_v44  ;;  %v2564_v1 = vld [vmem:[#allocation2 + $0x79] sm:$0xff]  ;;  %v1021_v18 = vmul.f32 %v2553_v44, %v2387_v63  ;;  %v956_v25 = vadd.f32 %v924_v7, %v859_v17 }
  0xdc   : > { %v1572_v48 = vadd.f32 %v2447_v59, %v1536_v43  ;;  %v467_v56 = vpop.f32.mrf.mxu0  ;;  %v1408_v28 = vmul.f32 %v2419_v29, %v2564_v1  ;;  %v553_v38 = vmax.f32 %v498_v26, 0.0  ;;  %v925_v42 = vmul.f32 %v2537_v11, %v2366_v52 }
  0xdd   : > { %v468_v61 = vadd.f32 %v2299_v27, %v467_v56  ;;  %2045 = vmatmul.msk.f32.gmra.mxu1 %vm597_vm2, %v1635_v47  ;;  %v1343_v31 = vadd.f32 %v1311_v50, %v1245_v62  ;;  %v1053_v37 = vadd.f32 %v1021_v18, %v956_v25  ;;  %v1118_v49 = vmul.f32 %v2564_v1, %v2402_v9 }
  0xde   : > { %v1604_v6 = vmax.f32 %v1572_v48, 0.0  ;;  %v585_v50 = vmin.f32 %v553_v38, 6.0  ;;  %v957_v55 = vadd.f32 %v925_v42, %v860_v0  ;;  %v732_v8 = vmul.f32 %v2553_v44, %v2346_v40 }
  0xdf   : > { %v543_v5 = vmax.f32 %v468_v61, 0.0  ;;  %v1440_v2 = vadd.f32 %v1408_v28, %v1343_v31  ;;  %v1150_v24 = vadd.f32 %v1118_v49, %v1053_v37  ;;  %v829_v10 = vmul.f32 %v2564_v1, %v2348_v41 }
  0xe0   : > { %v1636_v54 = vmin.f32 %v1604_v6, 6.0  ;;  %674 = vst.msk [vmem:[#allocation2 + $0x109] sm:$0xff] %vm597_vm2, %v585_v50 }
  0xe1   : > { %v575_v13 = vmin.f32 %v543_v5, 6.0  ;;  %v500_v5 = vpop.f32.mrf.mxu3 }
  0xe2   : > { %v2578_v14 = vld [vmem:[#allocation2 + $0x7a] sm:$0xff]  ;;  %v2587_v22 = vld [vmem:[#allocation2 + $0x82] sm:$0xff]  ;;  %v501_v60 = vadd.f32 %v2299_v27, %v500_v5 }
  0xe3   : > { %v1279_v15 = vld [vmem:[#allocation2 + $0x80] sm:$0xff]  ;;  %664 = vst.msk [vmem:[#allocation2 + $0x91] sm:$0xff] %vm597_vm2, %v575_v13  ;;  %v1505_v4 = vmul.f32 %v2426_v33, %v2578_v14  ;;  %v1506_v48 = vmul.f32 %v2426_v33, %v2587_v22  ;;  %v1215_v11 = vmul.f32 %v2578_v14, %v2408_v12  ;;  %v926_v44 = vmul.f32 %v2578_v14, %v2366_v52 }
  0xe4   : > { %v1376_v16 = vld [vmem:[#allocation2 + $0x81] sm:$0xff]  ;;  %v1312_v19 = vmul.f32 %v2416_v23, %v1279_v15  ;;  %v470_v21 = vpop.f32.mrf.mxu0  ;;  %v1022_v43 = vmul.f32 %v1279_v15, %v2387_v63  ;;  %v733_v17 = vmul.f32 %v1279_v15, %v2346_v40  ;;  %v861_v15 = vadd.f32 %v829_v10, %v732_v8 }
  0xe5   : > { %v471_v30 = vadd.f32 %v2299_v27, %v470_v21  ;;  %2046 = vmatmul.msk.f32.gmra.mxu1 %vm597_vm2, %v1636_v54  ;;  %v1537_v34 = vadd.f32 %v1505_v4, %v1440_v2  ;;  %v1409_v36 = vmul.f32 %v2419_v29, %v1376_v16  ;;  %v1119_v31 = vmul.f32 %v1376_v16, %v2402_v9 }
  0xe6   : > { %v1344_v35 = vadd.f32 %v1312_v19, %v1246_v46  ;;  %v1054_v62 = vadd.f32 %v1022_v43, %v957_v55  ;;  %v1247_v7 = vadd.f32 %v1215_v11, %v1150_v24  ;;  %v554_v46 = vmax.f32 %v501_v60, 0.0 }
  0xe7   : > { %v544_v3 = vmax.f32 %v471_v30, 0.0  ;;  %v1573_v45 = vadd.f32 %v2447_v59, %v1537_v34  ;;  %v830_v18 = vmul.f32 %v1376_v16, %v2348_v41  ;;  %v1216_v19 = vmul.f32 %v2587_v22, %v2408_v12 }
  0xe8   : > { %v1441_v47 = vadd.f32 %v1409_v36, %v1344_v35  ;;  %v1151_v28 = vadd.f32 %v1119_v31, %v1054_v62  ;;  %v586_v20 = vmin.f32 %v554_v46, 6.0 }
  0xe9   : > { %v576_v56 = vmin.f32 %v544_v3, 6.0  ;;  %v1605_v57 = vmax.f32 %v1573_v45, 0.0  ;;  %v862_v34 = vadd.f32 %v830_v18, %v733_v17  ;;  %v503_v38 = vpop.f32.mrf.mxu3  ;;  %v958_v45 = vadd.f32 %v926_v44, %v861_v15 }
  0xea   : > { %v1538_v58 = vadd.f32 %v1506_v48, %v1441_v47  ;;  %v2603_v61 = vld [vmem:[#allocation2 + $0x90] sm:$0xff]  ;;  %v1248_v26 = vadd.f32 %v1216_v19, %v1151_v28  ;;  %675 = vst.msk [vmem:[#allocation2 + $0x111] sm:$0xff] %vm597_vm2, %v586_v20  ;;  %v504_v47 = vadd.f32 %v2299_v27, %v503_v38  ;;  %v927_v48 = vmul.f32 %v2587_v22, %v2366_v52  ;;  %v1384_v38 = vld [vmem:[#allocation2 + $0xe1] sm:$0xff] }
  0xeb   : > { %665 = vst.msk [vmem:[#allocation2 + $0x99] sm:$0xff] %vm597_vm2, %v576_v56  ;;  %v1637_v51 = vmin.f32 %v1605_v57, 6.0  ;;  %v1313_v39 = vmul.f32 %v2416_v23, %v2603_v61  ;;  %v1377_v13 = vld [vmem:[#allocation2 + $0x91] sm:$0xff]  ;;  %v1023_v16 = vmul.f32 %v2603_v61, %v2387_v63 }
  0xec   : > { %v1574_v53 = vadd.f32 %v2447_v59, %v1538_v58  ;;  %v473_v6 = vpop.f32.mrf.mxu0  ;;  %v1410_v1 = vmul.f32 %v2419_v29, %v1377_v13  ;;  %v1120_v58 = vmul.f32 %v1377_v13, %v2402_v9  ;;  %v555_v11 = vmax.f32 %v504_v47, 0.0 }
  0xed   : > { %v474_v32 = vadd.f32 %v2299_v27, %v473_v6  ;;  %2047 = vmatmul.msk.f32.gmra.mxu1 %vm597_vm2, %v1637_v51  ;;  %v1345_v4 = vadd.f32 %v1313_v39, %v1247_v7  ;;  %v1055_v57 = vadd.f32 %v1023_v16, %v958_v45  ;;  %v959_v62 = vadd.f32 %v927_v48, %v862_v34  ;;  %v1481_v48 = vld [vmem:[#allocation2 + $0xe2] sm:$0xff] }
  0xee   : > { %v1606_v2 = vmax.f32 %v1574_v53, 0.0  ;;  %v587_v5 = vmin.f32 %v555_v11, 6.0  ;;  %v734_v6 = vmul.f32 %v2603_v61, %v2346_v40  ;;  %v831_v31 = vmul.f32 %v1377_v13, %v2348_v41 }
  0xef   : > { %v545_v54 = vmax.f32 %v474_v32, 0.0  ;;  %v1442_v36 = vadd.f32 %v1410_v1, %v1345_v4  ;;  %v1152_v10 = vadd.f32 %v1120_v58, %v1055_v57 }
  0xf0   : > { %v1638_v35 = vmin.f32 %v1606_v2, 6.0  ;;  %676 = vst.msk [vmem:[#allocation2 + $0x121] sm:$0xff] %vm597_vm2, %v587_v5  ;;  %v863_v44 = vadd.f32 %v831_v31, %v734_v6 }
  0xf1   : > { %v577_v21 = vmin.f32 %v545_v54, 6.0  ;;  %v506_v4 = vpop.f32.mrf.mxu3 }
  0xf2   : > { %v1474_v25 = vld [vmem:[#allocation2 + $0x92] sm:$0xff]  ;;  %v1475_v3 = vld [vmem:[#allocation2 + $0x9a] sm:$0xff]  ;;  %v507_v20 = vadd.f32 %v2299_v27, %v506_v4 }
  0xf3   : > { %v1281_v0 = vld [vmem:[#allocation2 + $0x98] sm:$0xff]  ;;  %666 = vst.msk [vmem:[#allocation2 + $0xa9] sm:$0xff] %vm597_vm2, %v577_v21  ;;  %v1507_v14 = vmul.f32 %v2426_v33, %v1474_v25  ;;  %v1508_v39 = vmul.f32 %v2426_v33, %v1475_v3  ;;  %v1217_v22 = vmul.f32 %v1474_v25, %v2408_v12  ;;  %v928_v46 = vmul.f32 %v1474_v25, %v2366_v52 }
  0xf4   : > { %v1378_v30 = vld [vmem:[#allocation2 + $0x99] sm:$0xff]  ;;  %v1314_v37 = vmul.f32 %v2416_v23, %v1281_v0  ;;  %v476_v42 = vpop.f32.mrf.mxu0  ;;  %v1024_v56 = vmul.f32 %v1281_v0, %v2387_v63  ;;  %v735_v17 = vmul.f32 %v1281_v0, %v2346_v40  ;;  %v556_v16 = vmax.f32 %v507_v20, 0.0 }
  0xf5   : > { %v1411_v43 = vmul.f32 %v2419_v29, %v1378_v30  ;;  %v477_v49 = vadd.f32 %v2299_v27, %v476_v42  ;;  %2048 = vmatmul.msk.f32.gmra.mxu1 %vm597_vm2, %v1638_v35  ;;  %v1539_v50 = vadd.f32 %v1507_v14, %v1442_v36  ;;  %v832_v18 = vmul.f32 %v1378_v30, %v2348_v41 }
  0xf6   : > { %v1346_v55 = vadd.f32 %v1314_v37, %v1248_v26  ;;  %v1056_v8 = vadd.f32 %v1024_v56, %v959_v62  ;;  %v1121_v2 = vmul.f32 %v1378_v30, %v2402_v9  ;;  %v1249_v25 = vadd.f32 %v1217_v22, %v1152_v10 }
  0xf7   : > { %v546_v51 = vmax.f32 %v477_v49, 0.0  ;;  %v1575_v53 = vadd.f32 %v2447_v59, %v1539_v50  ;;  %v960_v34 = vadd.f32 %v928_v46, %v863_v44  ;;  %v864_v35 = vadd.f32 %v832_v18, %v735_v17 }
  0xf8   : > { %v1443_v24 = vadd.f32 %v1411_v43, %v1346_v55  ;;  %v1153_v0 = vadd.f32 %v1121_v2, %v1056_v8  ;;  %v1218_v14 = vmul.f32 %v1475_v3, %v2408_v12  ;;  %v929_v37 = vmul.f32 %v1475_v3, %v2366_v52 }
  0xf9   : > { %v578_v60 = vmin.f32 %v546_v51, 6.0  ;;  %v1607_v32 = vmax.f32 %v1575_v53, 0.0  ;;  %v588_v42 = vmin.f32 %v556_v16, 6.0  ;;  %v2665_v51 = vmul.f32 %v2419_v29, %v1384_v38 }
  0xfa   : > { %v1540_v7 = vadd.f32 %v1508_v39, %v1443_v24  ;;  %v1282_v28 = vld [vmem:[#allocation2 + $0xa8] sm:$0xff]  ;;  %v1250_v55 = vadd.f32 %v1218_v14, %v1153_v0  ;;  %v961_v62 = vadd.f32 %v929_v37, %v864_v35  ;;  %v2671_v22 = vmul.f32 %v2426_v33, %v1481_v48 }
  0xfb   : > { %667 = vst.msk [vmem:[#allocation2 + $0xb1] sm:$0xff] %vm597_vm2, %v578_v60  ;;  %v1639_v54 = vmin.f32 %v1607_v32, 6.0  ;;  %v1315_v13 = vmul.f32 %v2416_v23, %v1282_v28  ;;  %v1025_v21 = vmul.f32 %v1282_v28, %v2387_v63  ;;  %v1379_v26 = vld [vmem:[#allocation2 + $0xa9] sm:$0xff]  ;;  %v736_v45 = vmul.f32 %v1282_v28, %v2346_v40  ;;  %v509_v60 = vpop.f32.mrf.mxu3 }
  0xfc   : > { %v1576_v61 = vadd.f32 %v2447_v59, %v1540_v7  ;;  %v479_v19 = vpop.f32.mrf.mxu0  ;;  %v833_v47 = vmul.f32 %v1379_v26, %v2348_v41  ;;  %v1412_v50 = vmul.f32 %v2419_v29, %v1379_v26  ;;  %677 = vst.msk [vmem:[#allocation2 + $0x129] sm:$0xff] %vm597_vm2, %v588_v42  ;;  %v1122_v3 = vmul.f32 %v1379_v26, %v2402_v9 }
  0xfd   : > { %v480_v1 = vadd.f32 %v2299_v27, %v479_v19  ;;  %2049 = vmatmul.msk.f32.gmra.mxu1 %vm597_vm2, %v1639_v54  ;;  %v1347_v30 = vadd.f32 %v1315_v13, %v1249_v25  ;;  %v1057_v43 = vadd.f32 %v1025_v21, %v960_v34  ;;  %v2677_v8 = vmul.f32 %v1384_v38, %v2402_v9 }
  0xfe   : > { %v1608_v15 = vmax.f32 %v1576_v61, 0.0  ;;  %v865_v7 = vadd.f32 %v833_v47, %v736_v45  ;;  %v510_v54 = vadd.f32 %v2299_v27, %v509_v60  ;;  %v2685_v61 = vmul.f32 %v1481_v48, %v2408_v12  ;;  %v2705_v45 = vld [vmem:[#allocation2 + $0xf0] sm:$0xff] }
  0xff   : > { %v547_v36 = vmax.f32 %v480_v1, 0.0  ;;  %v1444_v53 = vadd.f32 %v1412_v50, %v1347_v30  ;;  %v1154_v31 = vadd.f32 %v1122_v3, %v1057_v43  ;;  %v2688_v13 = vmul.f32 %v1384_v38, %v2348_v41 }
 0x100   : > { %v1640_v56 = vmin.f32 %v1608_v15, 6.0  ;;  %v557_v44 = vmax.f32 %v510_v54, 0.0  ;;  %v2695_v25 = vmul.f32 %v1481_v48, %v2366_v52 }
 0x101   : > { %v579_v49 = vmin.f32 %v547_v36, 6.0 }
 0x102   : > { %v1476_v57 = vld [vmem:[#allocation2 + $0xaa] sm:$0xff]  ;;  %v2673_v6 = vld [vmem:[#allocation2 + $0xb2] sm:$0xff]  ;;  %v589_v35 = vmin.f32 %v557_v44, 6.0 }
 0x103   : > { %v1283_v58 = vld [vmem:[#allocation2 + $0xb0] sm:$0xff]  ;;  %668 = vst.msk [vmem:[#allocation2 + $0xc1] sm:$0xff] %vm597_vm2, %v579_v49  ;;  %v1509_v24 = vmul.f32 %v2426_v33, %v1476_v57  ;;  %v1219_v18 = vmul.f32 %v1476_v57, %v2408_v12  ;;  %v1510_v20 = vmul.f32 %v2426_v33, %v2673_v6  ;;  %v930_v1 = vmul.f32 %v1476_v57, %v2366_v52  ;;  %v512_v49 = vpop.f32.mrf.mxu3 }
 0x104   : > { %v1380_v11 = vld [vmem:[#allocation2 + $0xb1] sm:$0xff]  ;;  %v1316_v39 = vmul.f32 %v2416_v23, %v1283_v58  ;;  %v482_v5 = vpop.f32.mrf.mxu0  ;;  %v1026_v32 = vmul.f32 %v1283_v58, %v2387_v63  ;;  %v1220_v36 = vmul.f32 %v2673_v6, %v2408_v12  ;;  %v737_v30 = vmul.f32 %v1283_v58, %v2346_v40  ;;  %678 = vst.msk [vmem:[#allocation2 + $0x139] sm:$0xff] %vm597_vm2, %v589_v35  ;;  %v2718_v58 = vld [vmem:[%s3172_s2] ss:$0 sm:$0xff] }
 0x105   : > { %v483_v10 = vadd.f32 %v2299_v27, %v482_v5  ;;  %2050 = vmatmul.msk.f32.gmra.mxu1 %vm597_vm2, %v1640_v56  ;;  %v1541_v28 = vadd.f32 %v1509_v24, %v1444_v53  ;;  %v1413_v17 = vmul.f32 %v2419_v29, %v1380_v11  ;;  %v1123_v15 = vmul.f32 %v1380_v11, %v2402_v9  ;;  %v2713_v57 = vld [vmem:[#allocation2 + $0xf2] sm:$0xff] }
 0x106   : > { %v1348_v46 = vadd.f32 %v1316_v39, %v1250_v55  ;;  %v1058_v21 = vadd.f32 %v1026_v32, %v961_v62  ;;  %v834_v14 = vmul.f32 %v1380_v11, %v2348_v41  ;;  %v1251_v42 = vadd.f32 %v1219_v18, %v1154_v31  ;;  %v2725_v31 = vld [vmem:[#allocation2 + $0xf1] sm:$0xff] }
 0x107   : > { %v548_v2 = vmax.f32 %v483_v10, 0.0  ;;  %v1577_v4 = vadd.f32 %v2447_v59, %v1541_v28  ;;  %v962_v50 = vadd.f32 %v930_v1, %v865_v7  ;;  %v2711_v56 = vmul.f32 %v2416_v23, %v2705_v45  ;;  %v2727_v32 = vld [vmem:[#allocation2 + $0xf8] sm:$0xff] }
 0x108   : > { %v1445_v19 = vadd.f32 %v1413_v17, %v1348_v46  ;;  %v1155_v48 = vadd.f32 %v1123_v15, %v1058_v21  ;;  %v513_v3 = vadd.f32 %v2718_v58, %v512_v49  ;;  %v866_v60 = vadd.f32 %v834_v14, %v737_v30  ;;  %v2745_v21 = vld [vmem:[#allocation2 + $0xf9] sm:$0xff] }
 0x109   : > { %v580_v27 = vmin.f32 %v548_v2, 6.0  ;;  %v1609_v26 = vmax.f32 %v1577_v4, 0.0  ;;  %v2731_v28 = vmul.f32 %v2419_v29, %v2725_v31  ;;  %v2735_v46 = vmul.f32 %v2426_v33, %v2713_v57  ;;  %v2747_v1 = vld [vmem:[#allocation2 + $0xfa] sm:$0xff] }
 0x10a   : > { %v1542_v0 = vadd.f32 %v1510_v20, %v1445_v19  ;;  %v1284_v16 = vld [vmem:[#allocation2 + $0xc0] sm:$0xff]  ;;  %v558_v10 = vmax.f32 %v513_v3, 0.0  ;;  %v1252_v18 = vadd.f32 %v1220_v36, %v1155_v48  ;;  %v931_v2 = vmul.f32 %v2673_v6, %v2366_v52 }
 0x10b   : > { %v1381_v34 = vld [vmem:[#allocation2 + $0xc1] sm:$0xff]  ;;  %669 = vst.msk [vmem:[#allocation2 + $0xc9] sm:$0xff] %vm597_vm2, %v580_v27  ;;  %v1641_v37 = vmin.f32 %v1609_v26, 6.0  ;;  %v1317_v43 = vmul.f32 %v2416_v23, %v1284_v16  ;;  %v1027_v55 = vmul.f32 %v1284_v16, %v2387_v63  ;;  %v738_v62 = vmul.f32 %v1284_v16, %v2346_v40 }
 0x10c   : > { %v1578_v38 = vadd.f32 %v2447_v59, %v1542_v0  ;;  %v485_v47 = vpop.f32.mrf.mxu0  ;;  %v835_v53 = vmul.f32 %v1381_v34, %v2348_v41  ;;  %v1414_v17 = vmul.f32 %v2419_v29, %v1381_v34  ;;  %v1124_v54 = vmul.f32 %v1381_v34, %v2402_v9 }
 0x10d   : > { %v486_v11 = vadd.f32 %v2718_v58, %v485_v47  ;;  %2051 = vmatmul.msk.f32.gmra.mxu1 %vm597_vm2, %v1641_v37  ;;  %v1349_v39 = vadd.f32 %v1317_v43, %v1251_v42  ;;  %v1059_v5 = vadd.f32 %v1027_v55, %v962_v50  ;;  %v590_v19 = vmin.f32 %v558_v10, 6.0  ;;  %v515_v43 = vpop.f32.mrf.mxu3  ;;  %v2776_v10 = vld [vmem:[#allocation2 + $0x108] sm:$0xff] }
 0x10e   : > { %v1610_v24 = vmax.f32 %v1578_v38, 0.0  ;;  %v867_v20 = vadd.f32 %v835_v53, %v738_v62  ;;  %v2743_v44 = vmul.f32 %v2416_v23, %v2727_v32  ;;  %v963_v35 = vadd.f32 %v931_v2, %v866_v60 }
 0x10f   : > { %v549_v7 = vmax.f32 %v486_v11, 0.0  ;;  %v1446_v26 = vadd.f32 %v1414_v17, %v1349_v39  ;;  %v1156_v34 = vadd.f32 %v1124_v54, %v1059_v5  ;;  %v2754_v14 = vmul.f32 %v2419_v29, %v2745_v21  ;;  %679 = vst.msk [vmem:[#allocation2 + $0x141] sm:$0xff] %vm597_vm2, %v590_v19 }
 0x110   : > { %v1642_v27 = vmin.f32 %v1610_v24, 6.0  ;;  %v2758_v37 = vmul.f32 %v2426_v33, %v2747_v1  ;;  %v2766_v48 = vmul.f32 %v2705_v45, %v2387_v63  ;;  %v516_v11 = vadd.f32 %v2718_v58, %v515_v43 }
 0x111   : > { %v581_v4 = vmin.f32 %v549_v7, 6.0  ;;  %v2784_v54 = vmul.f32 %v2713_v57, %v2408_v12  ;;  %v2788_v2 = vmul.f32 %v2416_v23, %v2776_v10 }
 0x112   : > { %v1478_v0 = vld [vmem:[#allocation2 + $0xc2] sm:$0xff]  ;;  %v1479_v30 = vld [vmem:[#allocation2 + $0xca] sm:$0xff]  ;;  %v559_v60 = vmax.f32 %v516_v11, 0.0 }
 0x113   : > { %v1285_v15 = vld [vmem:[#allocation2 + $0xc8] sm:$0xff]  ;;  %670 = vst.msk [vmem:[#allocation2 + $0xd9] sm:$0xff] %vm597_vm2, %v581_v4  ;;  %v1511_v6 = vmul.f32 %v2426_v33, %v1478_v0  ;;  %v1221_v42 = vmul.f32 %v1478_v0, %v2408_v12  ;;  %v1512_v55 = vmul.f32 %v2426_v33, %v1479_v30  ;;  %v932_v3 = vmul.f32 %v1478_v0, %v2366_v52 }
 0x114   : > { %v1382_v16 = vld [vmem:[#allocation2 + $0xc9] sm:$0xff]  ;;  %v1318_v36 = vmul.f32 %v2416_v23, %v1285_v15  ;;  %v1028_v47 = vmul.f32 %v1285_v15, %v2387_v63  ;;  %v739_v24 = vmul.f32 %v1285_v15, %v2346_v40 }
 0x115   : > { %v1415_v38 = vmul.f32 %v2419_v29, %v1382_v16  ;;  %2052 = vmatmul.msk.f32.gmra.mxu1 %vm597_vm2, %v1642_v27  ;;  %v1543_v49 = vadd.f32 %v1511_v6, %v1446_v26  ;;  %v1125_v53 = vmul.f32 %v1382_v16, %v2402_v9  ;;  %v836_v7 = vmul.f32 %v1382_v16, %v2348_v41 }
 0x116   : > { %v1350_v50 = vadd.f32 %v1318_v36, %v1252_v18  ;;  %v1060_v62 = vadd.f32 %v1028_v47, %v963_v35  ;;  %v2780_v18 = vmul.f32 %v2725_v31, %v2402_v9  ;;  %v591_v27 = vmin.f32 %v559_v60, 6.0 }
 0x117   : > { %v1579_v39 = vadd.f32 %v2447_v59, %v1543_v49  ;;  %v868_v26 = vadd.f32 %v836_v7, %v739_v24  ;;  %v1253_v0 = vadd.f32 %v1221_v42, %v1156_v34  ;;  %v964_v35 = vadd.f32 %v932_v3, %v867_v20 }
 0x118   : > { %v1447_v5 = vadd.f32 %v1415_v38, %v1350_v50  ;;  %v1157_v17 = vadd.f32 %v1125_v53, %v1060_v62  ;;  %v1222_v6 = vmul.f32 %v1479_v30, %v2408_v12  ;;  %v933_v36 = vmul.f32 %v1479_v30, %v2366_v52  ;;  %680 = vst.msk [vmem:[#allocation2 + $0x151] sm:$0xff] %vm597_vm2, %v591_v27  ;;  %v518_v30 = vpop.f32.mrf.mxu3 }
 0x119   : > { %v1611_v4 = vmax.f32 %v1579_v39, 0.0  ;;  %v1032_v50 = vmul.f32 %v2727_v32, %v2387_v63  ;;  %v519_v60 = vadd.f32 %v2718_v58, %v518_v30 }
 0x11a   : > { %v1544_v19 = vadd.f32 %v1512_v55, %v1447_v5  ;;  %v1286_v15 = vld [vmem:[#allocation2 + $0xd8] sm:$0xff]  ;;  %v1287_v49 = vld [vmem:[#allocation2 + $0xe0] sm:$0xff]  ;;  %v1254_v11 = vadd.f32 %v1222_v6, %v1157_v17  ;;  %v965_v24 = vadd.f32 %v933_v36, %v868_v26 }
 0x11b   : > { %v1383_v16 = vld [vmem:[#allocation2 + $0xd9] sm:$0xff]  ;;  %v1643_v38 = vmin.f32 %v1611_v4, 6.0  ;;  %v1319_v47 = vmul.f32 %v2416_v23, %v1286_v15  ;;  %v1029_v20 = vmul.f32 %v1286_v15, %v2387_v63  ;;  %v1320_v53 = vmul.f32 %v2416_v23, %v1287_v49 }
 0x11c   : > { %v1580_v43 = vadd.f32 %v2447_v59, %v1544_v19  ;;  %v1416_v34 = vmul.f32 %v2419_v29, %v1383_v16  ;;  %v1480_v42 = vld [vmem:[#allocation2 + $0xda] sm:$0xff]  ;;  %v1126_v55 = vmul.f32 %v1383_v16, %v2402_v9  ;;  %v1030_v5 = vmul.f32 %v1287_v49, %v2387_v63 }
 0x11d   : > { %2053 = vmatmul.msk.f32.gmra.mxu1 %vm597_vm2, %v1643_v38  ;;  %v1351_v62 = vadd.f32 %v1319_v47, %v1253_v0  ;;  %v1061_v39 = vadd.f32 %v1029_v20, %v964_v35  ;;  %v740_v7 = vmul.f32 %v1286_v15, %v2346_v40  ;;  %v1513_v19 = vmul.f32 %v2426_v33, %v1480_v42 }
 0x11e   : > { %v1612_v3 = vmax.f32 %v1580_v43, 0.0  ;;  %v1352_v27 = vadd.f32 %v1320_v53, %v1254_v11  ;;  %v837_v17 = vmul.f32 %v1383_v16, %v2348_v41  ;;  %v1223_v38 = vmul.f32 %v1480_v42, %v2408_v12 }
 0x11f   : > { %v1448_v4 = vadd.f32 %v1416_v34, %v1351_v62  ;;  %v1158_v6 = vadd.f32 %v1126_v55, %v1061_v39  ;;  %v1062_v0 = vadd.f32 %v1030_v5, %v965_v24  ;;  %v560_v43 = vmax.f32 %v519_v60, 0.0 }
 0x120   : > { %v869_v26 = vadd.f32 %v837_v17, %v740_v7  ;;  %v934_v35 = vmul.f32 %v1480_v42, %v2366_v52  ;;  %v741_v36 = vmul.f32 %v1287_v49, %v2346_v40  ;;  %v1644_v20 = vmin.f32 %v1612_v3, 6.0  ;;  %v521_v42 = vpop.f32.mrf.mxu3 }
 0x121   : > { %v1545_v47 = vadd.f32 %v1513_v19, %v1448_v4  ;;  %v1255_v30 = vadd.f32 %v1223_v38, %v1158_v6  ;;  %v1159_v15 = vadd.f32 %v2677_v8, %v1062_v0  ;;  %v592_v34 = vmin.f32 %v560_v43, 6.0  ;;  %v1387_v19 = vld [vmem:[#allocation2 + $0x109] sm:$0xff] }
 0x122   : > { %v1449_v16 = vadd.f32 %v2665_v51, %v1352_v27  ;;  %v966_v55 = vadd.f32 %v934_v35, %v869_v26  ;;  %v870_v62 = vadd.f32 %v2688_v13, %v741_v36  ;;  %v742_v49 = vmul.f32 %v2705_v45, %v2346_v40  ;;  %v2848_v6 = vld [vmem:[#allocation2 + $0x110] sm:$0xff] }
 0x123   : > { %v1581_v11 = vadd.f32 %v2447_v59, %v1545_v47  ;;  %v1353_v53 = vadd.f32 %v2711_v56, %v1255_v30  ;;  %v1256_v24 = vadd.f32 %v2685_v61, %v1159_v15  ;;  %681 = vst.msk [vmem:[#allocation2 + $0x159] sm:$0xff] %vm597_vm2, %v592_v34  ;;  %v839_v8 = vmul.f32 %v2725_v31, %v2348_v41  ;;  %v1484_v26 = vld [vmem:[#allocation2 + $0x10a] sm:$0xff] }
 0x124   : > { %v1063_v59 = vadd.f32 %v2766_v48, %v966_v55  ;;  %v522_v51 = vadd.f32 %v2718_v58, %v521_v42  ;;  %v1129_v13 = vmul.f32 %v2745_v21, %v2402_v9  ;;  %v1226_v61 = vmul.f32 %v2747_v1, %v2408_v12  ;;  %v1388_v15 = vld [vmem:[#allocation2 + $0x111] sm:$0xff] }
 0x125   : > { %2054 = vmatmul.msk.f32.gmra.mxu1 %vm597_vm2, %v1644_v20  ;;  %v1450_v56 = vadd.f32 %v2731_v28, %v1353_v53  ;;  %v1354_v3 = vadd.f32 %v2743_v44, %v1256_v24  ;;  %v967_v45 = vadd.f32 %v2695_v25, %v870_v62  ;;  %v871_v39 = vadd.f32 %v839_v8, %v742_v49 }
 0x126   : > { %v1613_v31 = vmax.f32 %v1581_v11, 0.0  ;;  %v1546_v5 = vadd.f32 %v2671_v22, %v1449_v16  ;;  %v1160_v48 = vadd.f32 %v2780_v18, %v1063_v59  ;;  %v561_v60 = vmax.f32 %v522_v51, 0.0  ;;  %v2844_v18 = vld [vmem:[%s3174_s4] ss:$0 sm:$0xff] }
 0x127   : > { %v1547_v7 = vadd.f32 %v2735_v46, %v1450_v56  ;;  %v1451_v4 = vadd.f32 %v2754_v14, %v1354_v3  ;;  %v1064_v27 = vadd.f32 %v1032_v50, %v967_v45  ;;  %v936_v28 = vmul.f32 %v2713_v57, %v2366_v52 }
 0x128   : > { %v1257_v44 = vadd.f32 %v2784_v54, %v1160_v48  ;;  %v1420_v25 = vmul.f32 %v2419_v29, %v1387_v19  ;;  %v593_v17 = vmin.f32 %v561_v60, 6.0  ;;  %v1033_v22 = vmul.f32 %v2776_v10, %v2387_v63  ;;  %v524_v36 = vpop.f32.mrf.mxu3 }
 0x129   : > { %v1583_v46 = vadd.f32 %v2844_v18, %v1547_v7  ;;  %v1548_v14 = vadd.f32 %v2758_v37, %v1451_v4  ;;  %v1161_v50 = vadd.f32 %v1129_v13, %v1064_v27  ;;  %v968_v57 = vadd.f32 %v936_v28, %v871_v39  ;;  %v1485_v39 = vld [vmem:[#allocation2 + $0x112] sm:$0xff]  ;;  %v1389_v27 = vld [vmem:[#allocation2 + $0x121] sm:$0xff] }
 0x12a   : > { %v1645_v54 = vmin.f32 %v1613_v31, 6.0  ;;  %v1582_v38 = vadd.f32 %v2844_v18, %v1546_v5  ;;  %v1355_v0 = vadd.f32 %v2788_v2, %v1257_v44  ;;  %682 = vst.msk [vmem:[#allocation2 + $0x169] sm:$0xff] %vm597_vm2, %v593_v17  ;;  %v1324_v43 = vmul.f32 %v2416_v23, %v2848_v6 }
 0x12b   : > { %v1615_v47 = vmax.f32 %v1583_v46, 0.0  ;;  %v1258_v35 = vadd.f32 %v1226_v61, %v1161_v50  ;;  %v1065_v20 = vadd.f32 %v1033_v22, %v968_v57  ;;  %v1130_v37 = vmul.f32 %v1387_v19, %v2402_v9  ;;  %v2869_v61 = vld [vmem:[#allocation2 + $0x120] sm:$0xff] }
 0x12c   : > { %v1517_v30 = vmul.f32 %v2426_v33, %v1484_v26  ;;  %v525_v34 = vadd.f32 %v2718_v58, %v524_v36  ;;  %v1584_v11 = vadd.f32 %v2844_v18, %v1548_v14  ;;  %v1452_v16 = vadd.f32 %v1420_v25, %v1355_v0  ;;  %v2888_v50 = vld [vmem:[%s3176_s6] ss:$0 sm:$0xff] }
 0x12d   : > { %2055 = vmatmul.msk.f32.gmra.mxu1 %vm597_vm2, %v1645_v54  ;;  %v1647_v2 = vmin.f32 %v1615_v47, 6.0  ;;  %v1421_v55 = vmul.f32 %v2419_v29, %v1388_v15  ;;  %v1614_v62 = vmax.f32 %v1582_v38, 0.0  ;;  %v743_v24 = vmul.f32 %v2727_v32, %v2346_v40 }
 0x12e   : > { %v562_v53 = vmax.f32 %v525_v34, 0.0  ;;  %v840_v42 = vmul.f32 %v2745_v21, %v2348_v41  ;;  %v1356_v49 = vadd.f32 %v1324_v43, %v1258_v35  ;;  %v1162_v8 = vadd.f32 %v1130_v37, %v1065_v20  ;;  %v1486_v43 = vld [vmem:[#allocation2 + $0x122] sm:$0xff] }
 0x12f   : > { %2057 = vmatmul.msk.f32.vlgmr.msra.gmra.mxu2 %vm597_vm2, %v1647_v2  ;;  %v1227_v59 = vmul.f32 %v1484_v26, %v2408_v12  ;;  %v937_v51 = vmul.f32 %v2747_v1, %v2366_v52  ;;  %v1034_v3 = vmul.f32 %v2848_v6, %v2387_v63  ;;  %v1616_v32 = vmax.f32 %v1584_v11, 0.0  ;;  %v1293_v35 = vld [vmem:[#allocation2 + $0x128] sm:$0xff] }
 0x130   : > { %v594_v13 = vmin.f32 %v562_v53, 6.0  ;;  %v872_v56 = vadd.f32 %v840_v42, %v743_v24  ;;  %v1549_v45 = vadd.f32 %v1517_v30, %v1452_v16  ;;  %v1646_v21 = vmin.f32 %v1614_v62, 6.0  ;;  %v527_v7 = vpop.f32.mrf.mxu3  ;;  %v2093_v53 = vld [vmem:[%s2193_s9] sm:$0xff]  ;;  %v1390_v42 = vld [vmem:[#allocation2 + $0x129] sm:$0xff] }
 0x131   : > { %v1518_v31 = vmul.f32 %v2426_v33, %v1485_v39  ;;  %v1453_v48 = vadd.f32 %v1421_v55, %v1356_v49  ;;  %v1259_v60 = vadd.f32 %v1227_v59, %v1162_v8  ;;  %v1325_v1 = vmul.f32 %v2416_v23, %v2869_v61 }
 0x132   : > { %683 = vst.msk [vmem:[#allocation2 + $0x171] sm:$0xff] %vm597_vm2, %v594_v13  ;;  %v969_v5 = vadd.f32 %v937_v51, %v872_v56  ;;  %v744_v4 = vmul.f32 %v2776_v10, %v2346_v40  ;;  %v528_v28 = vadd.f32 %v2718_v58, %v527_v7  ;;  %v1131_v25 = vmul.f32 %v1388_v15, %v2402_v9 }
 0x133   : > { %v841_v17 = vmul.f32 %v1387_v19, %v2348_v41  ;;  %v1648_v22 = vmin.f32 %v1616_v32, 6.0  ;;  %v1585_v46 = vadd.f32 %v2844_v18, %v1549_v45  ;;  %v938_v14 = vmul.f32 %v1484_v26, %v2366_v52 }
 0x134   : > { %v1066_v44 = vadd.f32 %v1034_v3, %v969_v5  ;;  %v563_v10 = vmax.f32 %v528_v28, 0.0  ;;  %v1550_v54 = vadd.f32 %v1518_v31, %v1453_v48  ;;  %v1357_v38 = vadd.f32 %v1325_v1, %v1259_v60  ;;  %v1487_v48 = vld [vmem:[#allocation2 + $0x12a] sm:$0xff] }
 0x135   : > { %2056 = vmatmul.msk.f32.gmra.mxu1 %vm597_vm2, %v1646_v21  ;;  %v873_v57 = vadd.f32 %v841_v17, %v744_v4  ;;  %v1422_v0 = vmul.f32 %v2419_v29, %v1389_v27  ;;  %v1228_v19 = vmul.f32 %v1485_v39, %v2408_v12  ;;  %v1035_v20 = vmul.f32 %v2869_v61, %v2387_v63 }
 0x136   : > { %v595_v47 = vmin.f32 %v563_v10, 6.0  ;;  %v1163_v26 = vadd.f32 %v1131_v25, %v1066_v44  ;;  %v1617_v30 = vmax.f32 %v1585_v46, 0.0  ;;  %v745_v34 = vmul.f32 %v2848_v6, %v2346_v40  ;;  %v2094_v10 = vld [vmem:[%s2193_s9 + $0x8] sm:$0xff] }
 0x137   : > { %2058 = vmatmul.msk.f32.gmra.mxu2 %vm597_vm2, %v1648_v22  ;;  %v970_v36 = vadd.f32 %v938_v14, %v873_v57  ;;  %v842_v2 = vmul.f32 %v1388_v15, %v2348_v41  ;;  %v1586_v16 = vadd.f32 %v2844_v18, %v1550_v54  ;;  %v1454_v55 = vadd.f32 %v1422_v0, %v1357_v38 }
 0x138   : > { %684 = vst.msk [vmem:[#allocation2 + $0x181] sm:$0xff] %vm597_vm2, %v595_v47  ;;  %v1519_v62 = vmul.f32 %v2426_v33, %v1486_v43  ;;  %v1326_v6 = vmul.f32 %v2416_v23, %v1293_v35  ;;  %v1260_v24 = vadd.f32 %v1228_v19, %v1163_v26  ;;  %v530_v49 = vpop.f32.mrf.mxu3  ;;  %v1132_v59 = vmul.f32 %v1389_v27, %v2402_v9  ;;  %v1391_v19 = vld [vmem:[#allocation2 + $0x139] sm:$0xff] }
 0x139   : > { %v1067_v8 = vadd.f32 %v1035_v20, %v970_v36  ;;  %v1649_v51 = vmin.f32 %v1617_v30, 6.0  ;;  %v531_v13 = vadd.f32 %v2718_v58, %v530_v49  ;;  %v874_v56 = vadd.f32 %v842_v2, %v745_v34  ;;  %v1488_v2 = vld [vmem:[#allocation2 + $0x13a] sm:$0xff]  ;;  %v2095_v49 = vld [vmem:[%s2193_s9 + $0x10] sm:$0xff] }
 0x13a   : > { %v1783_v37 = vpop.f32.mrf.mxu1  ;;  %v939_v3 = vmul.f32 %v1485_v39, %v2366_v52  ;;  %v1618_v32 = vmax.f32 %v1586_v16, 0.0  ;;  %v1551_v45 = vadd.f32 %v1519_v62, %v1454_v55  ;;  %v1423_v21 = vmul.f32 %v2419_v29, %v1390_v42  ;;  %v1294_v39 = vld [vmem:[#allocation2 + $0x138] sm:$0xff] }
 0x13b   : > { %v1784_v11 = vadd.f32 %v2888_v50, %v1783_v37  ;;  %v564_v31 = vmax.f32 %v531_v13, 0.0  ;;  %v1358_v5 = vadd.f32 %v1326_v6, %v1260_v24  ;;  %v1164_v60 = vadd.f32 %v1132_v59, %v1067_v8 }
 0x13c   : > { %v1229_v1 = vmul.f32 %v1486_v43, %v2408_v12  ;;  %v1036_v58 = vmul.f32 %v1293_v35, %v2387_v63  ;;  %v971_v28 = vadd.f32 %v939_v3, %v874_v56  ;;  %v746_v44 = vmul.f32 %v2869_v61, %v2346_v40 }
 0x13d   : > { %v1879_v15 = vadd.f32 %v2093_v53, %v1784_v11  ;;  %v596_v4 = vmin.f32 %v564_v31, 6.0  ;;  %v843_v25 = vmul.f32 %v1389_v27, %v2348_v41  ;;  %v1650_v22 = vmin.f32 %v1618_v32, 6.0  ;;  %v1392_v32 = vld [vmem:[#allocation2 + $0x141] sm:$0xff] }
 0x13e   : > { %v1587_v46 = vadd.f32 %v2844_v18, %v1551_v45  ;;  %v1520_v14 = vmul.f32 %v2426_v33, %v1487_v48  ;;  %v1455_v54 = vadd.f32 %v1423_v21, %v1358_v5  ;;  %v1327_v38 = vmul.f32 %v2416_v23, %v1294_v39 }
 0x13f   : > { %1911 = vst.msk [vmem:[%s2905_s15] sm:$0xff] %vm319_vm1, %v1879_v15  ;;  %2059 = vmatmul.msk.f32.gmra.mxu2 %vm597_vm2, %v1649_v51  ;;  %v1133_v0 = vmul.f32 %v1390_v42, %v2402_v9  ;;  %v1261_v61 = vadd.f32 %v1229_v1, %v1164_v60  ;;  %v1068_v27 = vadd.f32 %v1036_v58, %v971_v28 }
 0x140   : > { %685 = vst.msk [vmem:[#allocation2 + $0x189] sm:$0xff] %vm597_vm2, %v596_v4  ;;  %v875_v47 = vadd.f32 %v843_v25, %v746_v44  ;;  %v940_v26 = vmul.f32 %v1486_v43, %v2366_v52  ;;  %v747_v36 = vmul.f32 %v1293_v35, %v2346_v40  ;;  %v844_v20 = vmul.f32 %v1390_v42, %v2348_v41  ;;  %v1295_v43 = vld [vmem:[#allocation2 + $0x140] sm:$0xff] }
 0x141   : > { %v1619_v37 = vmax.f32 %v1587_v46, 0.0  ;;  %v1552_v30 = vadd.f32 %v1520_v14, %v1455_v54  ;;  %v1424_v34 = vmul.f32 %v2419_v29, %v1391_v19  ;;  %v1230_v11 = vmul.f32 %v1487_v48, %v2408_v12  ;;  %v1489_v25 = vld [vmem:[#allocation2 + $0x142] sm:$0xff]  ;;  %v2096_v54 = vld [vmem:[%s2193_s9 + $0x18] sm:$0xff] }
 0x142   : > { %v1786_v7 = vpop.f32.mrf.mxu1  ;;  %v1359_v55 = vadd.f32 %v1327_v38, %v1261_v61  ;;  %v1165_v62 = vadd.f32 %v1133_v0, %v1068_v27  ;;  %v972_v6 = vadd.f32 %v940_v26, %v875_v47  ;;  %v1037_v53 = vmul.f32 %v1294_v39, %v2387_v63 }
 0x143   : > { %v1787_v17 = vadd.f32 %v2888_v50, %v1786_v7  ;;  %v1521_v15 = vmul.f32 %v2426_v33, %v1488_v2  ;;  %v876_v24 = vadd.f32 %v844_v20, %v747_v36  ;;  %v941_v42 = vmul.f32 %v1487_v48, %v2366_v52  ;;  %v1393_v36 = vld [vmem:[#allocation2 + $0x151] sm:$0xff] }
 0x144   : > { %v1651_v59 = vmin.f32 %v1619_v37, 6.0  ;;  %v1588_v51 = vadd.f32 %v2844_v18, %v1552_v30  ;;  %v1328_v13 = vmul.f32 %v2416_v23, %v1295_v43  ;;  %v1456_v56 = vadd.f32 %v1424_v34, %v1359_v55 }
 0x145   : > { %v1880_v57 = vadd.f32 %v2094_v10, %v1787_v17  ;;  %v1262_v3 = vadd.f32 %v1230_v11, %v1165_v62  ;;  %v1069_v45 = vadd.f32 %v1037_v53, %v972_v6  ;;  %v1134_v21 = vmul.f32 %v1391_v19, %v2402_v9 }
 0x146   : > { %v973_v31 = vadd.f32 %v941_v42, %v876_v24  ;;  %v1038_v5 = vmul.f32 %v1295_v43, %v2387_v63  ;;  %v748_v48 = vmul.f32 %v1294_v39, %v2346_v40  ;;  %v845_v60 = vmul.f32 %v1391_v19, %v2348_v41  ;;  %v1490_v24 = vld [vmem:[#allocation2 + $0x152] sm:$0xff] }
 0x147   : > { %1912 = vst.msk [vmem:[%s2905_s15 + $0x8] sm:$0xff] %vm319_vm1, %v1880_v57  ;;  %2060 = vmatmul.msk.f32.gmra.mxu2 %vm597_vm2, %v1650_v22  ;;  %v1425_v1 = vmul.f32 %v2419_v29, %v1392_v32  ;;  %v1231_v58 = vmul.f32 %v1488_v2, %v2408_v12  ;;  %v1620_v4 = vmax.f32 %v1588_v51, 0.0  ;;  %v1553_v28 = vadd.f32 %v1521_v15, %v1456_v56  ;;  %v1296_v22 = vld [vmem:[#allocation2 + $0x150] sm:$0xff] }
 0x148   : > { %v1360_v44 = vadd.f32 %v1328_v13, %v1262_v3  ;;  %v1166_v17 = vadd.f32 %v1134_v21, %v1069_v45  ;;  %v1070_v14 = vadd.f32 %v1038_v5, %v973_v31  ;;  %v1135_v39 = vmul.f32 %v1392_v32, %v2402_v9  ;;  %v1394_v13 = vld [vmem:[#allocation2 + $0x159] sm:$0xff] }
 0x149   : > { %v877_v10 = vadd.f32 %v845_v60, %v748_v48  ;;  %v942_v57 = vmul.f32 %v1488_v2, %v2366_v52  ;;  %v1522_v0 = vmul.f32 %v2426_v33, %v1489_v25  ;;  %v1329_v61 = vmul.f32 %v2416_v23, %v1296_v22  ;;  %v2966_v2 = vld [vmem:[#allocation2 + $0x158] sm:$0xff] }
 0x14a   : > { %v1789_v16 = vpop.f32.mrf.mxu1  ;;  %v1652_v19 = vmin.f32 %v1620_v4, 6.0  ;;  %v1589_v27 = vadd.f32 %v2844_v18, %v1553_v28  ;;  %v1457_v47 = vadd.f32 %v1425_v1, %v1360_v44  ;;  %v1263_v26 = vadd.f32 %v1231_v58, %v1166_v17  ;;  %v1491_v60 = vld [vmem:[#allocation2 + $0x15a] sm:$0xff] }
 0x14b   : > { %v1790_v35 = vadd.f32 %v2888_v50, %v1789_v16  ;;  %v1167_v20 = vadd.f32 %v1135_v39, %v1070_v14  ;;  %v1232_v37 = vmul.f32 %v1489_v25, %v2408_v12  ;;  %v974_v30 = vadd.f32 %v942_v57, %v877_v10 }
 0x14c   : > { %v1039_v34 = vmul.f32 %v1296_v22, %v2387_v63  ;;  %v749_v11 = vmul.f32 %v1295_v43, %v2346_v40  ;;  %v846_v16 = vmul.f32 %v1392_v32, %v2348_v41  ;;  %v1621_v62 = vmax.f32 %v1589_v27, 0.0  ;;  %v2097_v43 = vld [vmem:[%s2193_s9 + $0x20] sm:$0xff] }
 0x14d   : > { %v1881_v8 = vadd.f32 %v2095_v49, %v1790_v35  ;;  %v1554_v6 = vadd.f32 %v1522_v0, %v1457_v47  ;;  %v1361_v53 = vadd.f32 %v1329_v61, %v1263_v26  ;;  %v1426_v35 = vmul.f32 %v2419_v29, %v1393_v36  ;;  %v2098_v61 = vld [vmem:[%s2193_s9 + $0x28] sm:$0xff] }
 0x14e   : > { %v1264_v42 = vadd.f32 %v1232_v37, %v1167_v20  ;;  %v1330_v49 = vmul.f32 %v2416_v23, %v2966_v2  ;;  %v878_v56 = vadd.f32 %v846_v16, %v749_v11  ;;  %v943_v3 = vmul.f32 %v1489_v25, %v2366_v52  ;;  %v1492_v16 = vld [vmem:[#allocation2 + $0x16a] sm:$0xff] }
 0x14f   : > { %1913 = vst.msk [vmem:[%s2905_s15 + $0x10] sm:$0xff] %vm319_vm1, %v1881_v8  ;;  %2061 = vmatmul.msk.f32.gmra.mxu2 %vm597_vm2, %v1651_v59  ;;  %v1071_v8 = vadd.f32 %v1039_v34, %v974_v30  ;;  %v1136_v59 = vmul.f32 %v1393_v36, %v2402_v9  ;;  %v1653_v32 = vmin.f32 %v1621_v62, 6.0  ;;  %v1590_v45 = vadd.f32 %v2844_v18, %v1554_v6  ;;  %v3003_v62 = vld [vmem:[#allocation2 + $0x170] sm:$0xff] }
 0x150   : > { %v1458_v21 = vadd.f32 %v1426_v35, %v1361_v53  ;;  %v1523_v31 = vmul.f32 %v2426_v33, %v1490_v24  ;;  %v1362_v5 = vadd.f32 %v1330_v49, %v1264_v42  ;;  %v1427_v48 = vmul.f32 %v2419_v29, %v1394_v13 }
 0x151   : > { %v1168_v1 = vadd.f32 %v1136_v59, %v1071_v8  ;;  %v1233_v58 = vmul.f32 %v1490_v24, %v2408_v12  ;;  %v975_v4 = vadd.f32 %v943_v3, %v878_v56  ;;  %v1040_v28 = vmul.f32 %v2966_v2, %v2387_v63  ;;  %v2099_v56 = vld [vmem:[%s2193_s9 + $0x30] sm:$0xff] }
 0x152   : > { %v1792_v7 = vpop.f32.mrf.mxu1  ;;  %v750_v44 = vmul.f32 %v1296_v22, %v2346_v40  ;;  %v847_v25 = vmul.f32 %v1393_v36, %v2348_v41  ;;  %v1555_v14 = vadd.f32 %v1523_v31, %v1458_v21  ;;  %v1524_v10 = vmul.f32 %v2426_v33, %v1491_v60  ;;  %v1395_v22 = vld [vmem:[#allocation2 + $0x169] sm:$0xff]  ;;  %v1396_v21 = vld [vmem:[#allocation2 + $0x171] sm:$0xff] }
 0x153   : > { %v1793_v46 = vadd.f32 %v2888_v50, %v1792_v7  ;;  %v2984_v7 = vld [vmem:[#allocation2 + $0x168] sm:$0xff]  ;;  %v1459_v57 = vadd.f32 %v1427_v48, %v1362_v5  ;;  %v1137_v0 = vmul.f32 %v1394_v13, %v2402_v9  ;;  %v1072_v27 = vadd.f32 %v1040_v28, %v975_v4  ;;  %v1493_v28 = vld [vmem:[#allocation2 + $0x172] sm:$0xff] }
 0x154   : > { %v879_v47 = vadd.f32 %v847_v25, %v750_v44  ;;  %v944_v26 = vmul.f32 %v1490_v24, %v2366_v52  ;;  %v1591_v20 = vadd.f32 %v2844_v18, %v1555_v14  ;;  %v1428_v30 = vmul.f32 %v2419_v29, %v1395_v22 }
 0x155   : > { %v1882_v38 = vadd.f32 %v2096_v54, %v1793_v46  ;;  %v1622_v46 = vmax.f32 %v1590_v45, 0.0  ;;  %v1265_v54 = vadd.f32 %v1233_v58, %v1168_v1  ;;  %v1234_v34 = vmul.f32 %v1491_v60, %v2408_v12 }
 0x156   : > { %v1556_v11 = vadd.f32 %v1524_v10, %v1459_v57  ;;  %v976_v6 = vadd.f32 %v944_v26, %v879_v47  ;;  %v1041_v53 = vmul.f32 %v2984_v7, %v2387_v63  ;;  %v751_v24 = vmul.f32 %v2966_v2, %v2346_v40 }
 0x157   : > { %1914 = vst.msk [vmem:[%s2905_s15 + $0x18] sm:$0xff] %vm319_vm1, %v1882_v38  ;;  %2062 = vmatmul.msk.f32.gmra.mxu2 %vm597_vm2, %v1652_v19  ;;  %v1331_v38 = vmul.f32 %v2416_v23, %v2984_v7  ;;  %v1654_v36 = vmin.f32 %v1622_v46, 6.0  ;;  %v848_v42 = vmul.f32 %v1394_v13, %v2348_v41  ;;  %v1525_v59 = vmul.f32 %v2426_v33, %v1492_v16 }
 0x158   : > { %v1073_v2 = vadd.f32 %v1041_v53, %v976_v6  ;;  %v945_v13 = vmul.f32 %v1491_v60, %v2366_v52  ;;  %v1429_v1 = vmul.f32 %v2419_v29, %v1396_v21  ;;  %v1235_v25 = vmul.f32 %v1492_v16, %v2408_v12  ;;  %v1494_v6 = vld [vmem:[#allocation2 + $0x182] sm:$0xff] }
 0x159   : > { %v1363_v37 = vadd.f32 %v1331_v38, %v1265_v54  ;;  %v880_v5 = vadd.f32 %v848_v42, %v751_v24  ;;  %v1042_v60 = vmul.f32 %v3003_v62, %v2387_v63  ;;  %v849_v10 = vmul.f32 %v1395_v22, %v2348_v41 }
 0x15a   : > { %v1795_v55 = vpop.f32.mrf.mxu1  ;;  %v1526_v38 = vmul.f32 %v2426_v33, %v1493_v28  ;;  %v1236_v53 = vmul.f32 %v1493_v28, %v2408_v12 }
 0x15b   : > { %v1796_v15 = vadd.f32 %v2888_v50, %v1795_v55  ;;  %v1169_v55 = vadd.f32 %v1137_v0, %v1072_v27  ;;  %v1460_v8 = vadd.f32 %v1428_v30, %v1363_v37  ;;  %v977_v14 = vadd.f32 %v945_v13, %v880_v5  ;;  %v1398_v13 = vld [vmem:[#allocation2 + $0x189] sm:$0xff] }
 0x15d   : > { %v1883_v51 = vadd.f32 %v2097_v43, %v1796_v15  ;;  %v1623_v15 = vmax.f32 %v1591_v20, 0.0  ;;  %v1332_v43 = vmul.f32 %v2416_v23, %v3003_v62  ;;  %v1266_v45 = vadd.f32 %v1234_v34, %v1169_v55 }
 0x15e   : > { %v1557_v48 = vadd.f32 %v1525_v59, %v1460_v8  ;;  %v1074_v20 = vadd.f32 %v1042_v60, %v977_v14  ;;  %v850_v8 = vmul.f32 %v1396_v21, %v2348_v41  ;;  %v947_v41 = vmul.f32 %v1493_v28, %v2366_v52 }
 0x15f   : > { %1915 = vst.msk [vmem:[%s2905_s15 + $0x20] sm:$0xff] %vm319_vm1, %v1883_v51  ;;  %2063 = vmatmul.msk.f32.gmra.mxu2 %vm597_vm2, %v1653_v32  ;;  %v1138_v51 = vmul.f32 %v1395_v22, %v2402_v9  ;;  %v1592_v32 = vadd.f32 %v2844_v18, %v1556_v11  ;;  %v1655_v31 = vmin.f32 %v1623_v15, 6.0  ;;  %v1364_v4 = vadd.f32 %v1332_v43, %v1266_v45 }
 0x160   : > { %v1593_v54 = vadd.f32 %v2844_v18, %v1557_v48  ;;  %v946_v22 = vmul.f32 %v1492_v16, %v2366_v52  ;;  %v753_v16 = vmul.f32 %v3003_v62, %v2346_v40 }
 0x161   : > { %v1624_v58 = vmax.f32 %v1592_v32, 0.0  ;;  %v1170_v44 = vadd.f32 %v1138_v51, %v1073_v2  ;;  %v1461_v47 = vadd.f32 %v1429_v1, %v1364_v4  ;;  %v1527_v51 = vmul.f32 %v2426_v33, %v1494_v6 }
 0x162   : > { %v1798_v17 = vpop.f32.mrf.mxu1  ;;  %v1625_v30 = vmax.f32 %v1593_v54, 0.0  ;;  %v882_v62 = vadd.f32 %v850_v8, %v753_v16  ;;  %v1431_v1 = vmul.f32 %v2419_v29, %v1398_v13  ;;  %v1237_v4 = vmul.f32 %v1494_v6, %v2408_v12 }
 0x163   : > { %v1799_v39 = vadd.f32 %v2888_v50, %v1798_v17  ;;  %v1300_v17 = vld [vmem:[#allocation2 + $0x180] sm:$0xff]  ;;  %v1656_v27 = vmin.f32 %v1624_v58, 6.0  ;;  %v1267_v26 = vadd.f32 %v1235_v25, %v1170_v44  ;;  %v1558_v11 = vadd.f32 %v1526_v38, %v1461_v47  ;;  %v1495_v58 = vld [vmem:[#allocation2 + $0x18a] sm:$0xff] }
 0x164   : > { %v1333_v0 = vmul.f32 %v2416_v23, %v1300_v17  ;;  %v1043_v15 = vmul.f32 %v1300_v17, %v2387_v63  ;;  %v1657_v43 = vmin.f32 %v1625_v30, 6.0  ;;  %v979_v14 = vadd.f32 %v947_v41, %v882_v62  ;;  %v1303_v30 = vld [vmem:[#allocation2 + $0x1a0] sm:$0xff] }
 0x165   : > { %v1884_v19 = vadd.f32 %v2098_v61, %v1799_v39  ;;  %v752_v39 = vmul.f32 %v2984_v7, %v2346_v40  ;;  %v2100_v61 = vld [vmem:[%s2193_s9 + $0x38] sm:$0xff]  ;;  %v1139_v7 = vmul.f32 %v1396_v21, %v2402_v9  ;;  %v1594_v45 = vadd.f32 %v2844_v18, %v1558_v11  ;;  %v2105_v62 = vld [vmem:[%s2193_s9 + $0x60] sm:$0xff] }
 0x166   : > { %v1365_v55 = vadd.f32 %v1333_v0, %v1267_v26  ;;  %v1528_v60 = vmul.f32 %v2426_v33, %v1495_v58  ;;  %v1238_v26 = vmul.f32 %v1495_v58, %v2408_v12  ;;  %v1496_v11 = vld [vmem:[#allocation2 + $0x19a] sm:$0xff] }
 0x167   : > { %1916 = vst.msk [vmem:[%s2905_s15 + $0x28] sm:$0xff] %vm319_vm1, %v1884_v19  ;;  %2064 = vmatmul.msk.f32.gmra.mxu2 %vm597_vm2, %v1654_v36  ;;  %v1397_v36 = vld [vmem:[#allocation2 + $0x181] sm:$0xff]  ;;  %v881_v37 = vadd.f32 %v849_v10, %v752_v39  ;;  %v1171_v42 = vadd.f32 %v1139_v7, %v1074_v20  ;;  %v1626_v21 = vmax.f32 %v1594_v45, 0.0 }
 0x168   : > { %v1430_v34 = vmul.f32 %v2419_v29, %v1397_v36  ;;  %v2102_v39 = vld [vmem:[%s2193_s9 + $0x48] sm:$0xff] }
 0x169   : > { %v1268_v5 = vadd.f32 %v1236_v53, %v1171_v42  ;;  %v1336_v53 = vmul.f32 %v2416_v23, %v1303_v30  ;;  %v1400_v42 = vld [vmem:[#allocation2 + $0x1a1] sm:$0xff] }
 0x16a   : > { %v1801_v35 = vpop.f32.mrf.mxu1  ;;  %v1462_v2 = vadd.f32 %v1430_v34, %v1365_v55 }
 0x16b   : > { %v1802_v49 = vadd.f32 %v2888_v50, %v1801_v35  ;;  %v1301_v35 = vld [vmem:[#allocation2 + $0x188] sm:$0xff] }
 0x16c   : > { %v1559_v48 = vadd.f32 %v1527_v51, %v1462_v2  ;;  %v1044_v52 = vmul.f32 %v1301_v35, %v2387_v63  ;;  %v1399_v63 = vld [vmem:[#allocation2 + $0x199] sm:$0xff]  ;;  %v1497_v51 = vld [vmem:[#allocation2 + $0x1a2] sm:$0xff] }
 0x16d   : > { %v1885_v3 = vadd.f32 %v2099_v56, %v1802_v49  ;;  %v978_v49 = vadd.f32 %v946_v22, %v881_v37  ;;  %v1334_v56 = vmul.f32 %v2416_v23, %v1301_v35  ;;  %v1432_v37 = vmul.f32 %v2419_v29, %v1399_v63 }
 0x16e   : > { %v1595_v54 = vadd.f32 %v2844_v18, %v1559_v48 }
 0x16f   : > { %1917 = vst.msk [vmem:[%s2905_s15 + $0x30] sm:$0xff] %vm319_vm1, %v1885_v3  ;;  %2065 = vmatmul.msk.f32.gmra.mxu2 %vm597_vm2, %v1655_v31  ;;  %v2101_v3 = vld [vmem:[%s2193_s9 + $0x40] sm:$0xff]  ;;  %v1140_v31 = vmul.f32 %v1397_v36, %v2402_v9  ;;  %v1075_v40 = vadd.f32 %v1043_v15, %v978_v49  ;;  %v1366_v25 = vadd.f32 %v1334_v56, %v1268_v5  ;;  %v2104_v56 = vld [vmem:[%s2193_s9 + $0x58] sm:$0xff] }
 0x170   : > { %v1627_v47 = vmax.f32 %v1595_v54, 0.0  ;;  %v1529_v15 = vmul.f32 %v2426_v33, %v1496_v11  ;;  %v2109_v54 = vld [vmem:[%s2193_s9 + $0x80] sm:$0xff] }
 0x171   : > { %v1172_v17 = vadd.f32 %v1140_v31, %v1075_v40  ;;  %v1463_v0 = vadd.f32 %v1431_v1, %v1366_v25  ;;  %v1530_v31 = vmul.f32 %v2426_v33, %v1497_v51  ;;  %v2113_v11 = vld [vmem:[%s2193_s9 + $0xa0] sm:$0xff] }
 0x172   : > { %v1804_v46 = vpop.f32.mrf.mxu1  ;;  %v1659_v6 = vmin.f32 %v1627_v47, 6.0  ;;  %v2117_v51 = vld [vmem:[%s2193_s9 + $0xc0] sm:$0xff] }
 0x173   : > { %v1805_v57 = vadd.f32 %v2888_v50, %v1804_v46  ;;  %v1302_v46 = vld [vmem:[#allocation2 + $0x198] sm:$0xff]  ;;  %v1560_v20 = vadd.f32 %v1528_v60, %v1463_v0 }
 0x174   : > { %v1335_v38 = vmul.f32 %v2416_v23, %v1302_v46  ;;  %v2107_v46 = vld [vmem:[%s2193_s9 + $0x70] sm:$0xff] }
 0x175   : > { %v1886_v19 = vadd.f32 %v2100_v61, %v1805_v57  ;;  %v1658_v57 = vmin.f32 %v1626_v21, 6.0  ;;  %v1269_v61 = vadd.f32 %v1237_v4, %v1172_v17  ;;  %v1596_v35 = vadd.f32 %v2844_v18, %v1560_v20  ;;  %v2106_v4 = vld [vmem:[%s2193_s9 + $0x68] sm:$0xff] }
 0x177   : > { %1918 = vst.msk [vmem:[%s2905_s15 + $0x38] sm:$0xff] %vm319_vm1, %v1886_v19  ;;  %2066 = vmatmul.msk.f32.gmra.mxu2 %vm597_vm2, %v1656_v27  ;;  %v1076_v19 = vadd.f32 %v1044_v52, %v979_v14  ;;  %v1141_v27 = vmul.f32 %v1398_v13, %v2402_v9  ;;  %v1367_v7 = vadd.f32 %v1335_v38, %v1269_v61  ;;  %v2103_v9 = vld [vmem:[%s2193_s9 + $0x50] sm:$0xff]  ;;  %v1628_v16 = vmax.f32 %v1596_v35, 0.0 }
 0x179   : > { %v1173_v22 = vadd.f32 %v1141_v27, %v1076_v19  ;;  %v1464_v12 = vadd.f32 %v1432_v37, %v1367_v7  ;;  %v2110_v19 = vld [vmem:[%s2193_s9 + $0x88] sm:$0xff]  ;;  %v2112_v37 = vld [vmem:[%s2193_s9 + $0x98] sm:$0xff] }
 0x17a   : > { %v1807_v24 = vpop.f32.mrf.mxu1 }
 0x17b   : > { %v1808_v59 = vadd.f32 %v2888_v50, %v1807_v24  ;;  %v1270_v24 = vadd.f32 %v1238_v26, %v1173_v22  ;;  %v1561_v8 = vadd.f32 %v1529_v15, %v1464_v12  ;;  %v2111_v26 = vld [vmem:[%s2193_s9 + $0x90] sm:$0xff] }
 0x17d   : > { %v1887_v32 = vadd.f32 %v2101_v3, %v1808_v59  ;;  %v1368_v59 = vadd.f32 %v1336_v53, %v1270_v24  ;;  %v1597_v45 = vadd.f32 %v2844_v18, %v1561_v8  ;;  %v2114_v53 = vld [vmem:[%s2193_s9 + $0xa8] sm:$0xff]  ;;  %v2115_v24 = vld [vmem:[%s2193_s9 + $0xb0] sm:$0xff]  ;;  %v2116_v8 = vld [vmem:[%s2193_s9 + $0xb8] sm:$0xff] }
 0x17f   : > { %1919 = vst.msk [vmem:[%s2905_s15 + $0x40] sm:$0xff] %vm319_vm1, %v1887_v32  ;;  %2067 = vmatmul.msk.f32.gmra.mxu2 %vm597_vm2, %v1657_v43  ;;  %v1433_v43 = vmul.f32 %v2419_v29, %v1400_v42  ;;  %v1660_v32 = vmin.f32 %v1628_v16, 6.0  ;;  %v1629_v29 = vmax.f32 %v1597_v45, 0.0  ;;  %v2118_v45 = vld [vmem:[%s2193_s9 + $0xc8] sm:$0xff] }
 0x181   : > { %v1465_v2 = vadd.f32 %v1433_v43, %v1368_v59  ;;  %v1661_v21 = vmin.f32 %v1629_v29, 6.0  ;;  %v2119_v29 = vld [vmem:[%s2193_s9 + $0xd0] sm:$0xff] }
 0x182   : > { %v1810_v44 = vpop.f32.mrf.mxu1 }
 0x183   : > { %v1811_v28 = vadd.f32 %v2888_v50, %v1810_v44  ;;  %v1562_v13 = vadd.f32 %v1530_v31, %v1465_v2 }
 0x185   : > { %v1888_v10 = vadd.f32 %v2102_v39, %v1811_v28  ;;  %v1598_v48 = vadd.f32 %v2844_v18, %v1562_v13 }
 0x187   : > { %1920 = vst.msk [vmem:[%s2905_s15 + $0x48] sm:$0xff] %vm319_vm1, %v1888_v10  ;;  %2068 = vmatmul.msk.f32.gmra.mxu2 %vm597_vm2, %v1658_v57  ;;  %v1630_v1 = vmax.f32 %v1598_v48, 0.0  ;;  %v2108_v10 = vld [vmem:[%s2193_s9 + $0x78] sm:$0xff] }
 0x189   : > { %v1662_v25 = vmin.f32 %v1630_v1, 6.0  ;;  %v2121_v1 = vld [vmem:[%s2193_s9 + $0xe0] sm:$0xff] }
 0x18a   : > { %v1813_v36 = vpop.f32.mrf.mxu1 }
 0x18b   : > { %v1814_v34 = vadd.f32 %v2888_v50, %v1813_v36 }
 0x18d   : > { %v1889_v55 = vadd.f32 %v2103_v9, %v1814_v34 }
 0x18f   : > { %1921 = vst.msk [vmem:[%s2905_s15 + $0x50] sm:$0xff] %vm319_vm1, %v1889_v55  ;;  %2069 = vmatmul.msk.f32.gmra.mxu2 %vm597_vm2, %v1659_v6 }
 0x192   : > { %v1816_v49 = vpop.f32.mrf.mxu1 }
 0x193   : > { %v1817_v23 = vadd.f32 %v2888_v50, %v1816_v49 }
 0x195   : > { %v1890_v3 = vadd.f32 %v2104_v56, %v1817_v23 }
 0x197   : > { %1922 = vst.msk [vmem:[%s2905_s15 + $0x58] sm:$0xff] %vm319_vm1, %v1890_v3  ;;  %2070 = vmatmul.msk.f32.gmra.mxu2 %vm597_vm2, %v1660_v32 }
 0x19a   : > { %v1819_v5 = vpop.f32.mrf.mxu1 }
 0x19b   : > { %v1820_v40 = vadd.f32 %v2888_v50, %v1819_v5 }
 0x19d   : > { %v1891_v41 = vadd.f32 %v2105_v62, %v1820_v40 }
 0x19f   : > { %1923 = vst.msk [vmem:[%s2905_s15 + $0x60] sm:$0xff] %vm319_vm1, %v1891_v41  ;;  %2071 = vmatmul.msk.f32.gmra.mxu2 %vm597_vm2, %v1661_v21  ;;  %v2120_v41 = vld [vmem:[%s2193_s9 + $0xd8] sm:$0xff] }
 0x1a2   : > { %v1822_v33 = vpop.f32.mrf.mxu1 }
 0x1a3   : > { %v1823_v58 = vadd.f32 %v2888_v50, %v1822_v33 }
 0x1a5   : > { %v1892_v44 = vadd.f32 %v2106_v4, %v1823_v58 }
 0x1a7   : > { %1924 = vst.msk [vmem:[%s2905_s15 + $0x68] sm:$0xff] %vm319_vm1, %v1892_v44  ;;  %2072 = vmatmul.msk.f32.gmra.mxu2 %vm597_vm2, %v1662_v25  ;;  %v2122_v25 = vld [vmem:[%s2193_s9 + $0xe8] sm:$0xff] }
 0x1aa   : > { %v1825_v18 = vpop.f32.mrf.mxu1 }
 0x1ab   : > { %v1826_v17 = vadd.f32 %v2888_v50, %v1825_v18 }
 0x1ad   : > { %v1893_v14 = vadd.f32 %v2107_v46, %v1826_v17 }
 0x1af   : > { %1925 = vst.msk [vmem:[%s2905_s15 + $0x70] sm:$0xff] %vm319_vm1, %v1893_v14  ;;  %v2123_v14 = vld [vmem:[%s2193_s9 + $0xf0] sm:$0xff] }
 0x1b2   : > { %v1828_v52 = vpop.f32.mrf.mxu1  ;;  %v1831_v60 = vpop.f32.mrf.mxu2 }
 0x1b3   : > { %v1829_v28 = vadd.f32 %v2888_v50, %v1828_v52  ;;  %v1832_v39 = vadd.f32 %v2888_v50, %v1831_v60 }
 0x1b5   : > { %v1894_v57 = vadd.f32 %v2108_v10, %v1829_v28  ;;  %v1895_v38 = vadd.f32 %v2109_v54, %v1832_v39  ;;  %v2124_v39 = vld [vmem:[%s2193_s9 + $0xf8] sm:$0xff] }
 0x1b7   : > { %1926 = vst.msk [vmem:[%s2905_s15 + $0x78] sm:$0xff] %vm319_vm1, %v1894_v57 }
 0x1b8   : > { %1927 = vst.msk [vmem:[%s2905_s15 + $0x80] sm:$0xff] %vm319_vm1, %v1895_v38 }
 0x1ba   : > { %v1834_v0 = vpop.f32.mrf.mxu2 }
 0x1bb   : > { %v1835_v61 = vadd.f32 %v2888_v50, %v1834_v0 }
 0x1bd   : > { %v1896_v27 = vadd.f32 %v2110_v19, %v1835_v61 }
 0x1bf   : > { %1928 = vst.msk [vmem:[%s2905_s15 + $0x88] sm:$0xff] %vm319_vm1, %v1896_v27 }
 0x1c2   : > { %v1837_v63 = vpop.f32.mrf.mxu2 }
 0x1c3   : > { %v1838_v47 = vadd.f32 %v2888_v50, %v1837_v63 }
 0x1c5   : > { %v1897_v36 = vadd.f32 %v2111_v26, %v1838_v47 }
 0x1c7   : > { %1929 = vst.msk [vmem:[%s2905_s15 + $0x90] sm:$0xff] %vm319_vm1, %v1897_v36 }
 0x1ca   : > { %v1840_v20 = vpop.f32.mrf.mxu2 }
 0x1cb   : > { %v1841_v7 = vadd.f32 %v2888_v50, %v1840_v20 }
 0x1cd   : > { %v1898_v22 = vadd.f32 %v2112_v37, %v1841_v7 }
 0x1cf   : > { %1930 = vst.msk [vmem:[%s2905_s15 + $0x98] sm:$0xff] %vm319_vm1, %v1898_v22 }
 0x1d2   : > { %v1843_v30 = vpop.f32.mrf.mxu2 }
 0x1d3   : > { %v1844_v34 = vadd.f32 %v2888_v50, %v1843_v30 }
 0x1d5   : > { %v1899_v9 = vadd.f32 %v2113_v11, %v1844_v34 }
 0x1d7   : > { %1931 = vst.msk [vmem:[%s2905_s15 + $0xa0] sm:$0xff] %vm319_vm1, %v1899_v9 }
 0x1da   : > { %v1846_v55 = vpop.f32.mrf.mxu2 }
 0x1db   : > { %v1847_v6 = vadd.f32 %v2888_v50, %v1846_v55 }
 0x1dd   : > { %v1900_v35 = vadd.f32 %v2114_v53, %v1847_v6 }
 0x1df   : > { %1932 = vst.msk [vmem:[%s2905_s15 + $0xa8] sm:$0xff] %vm319_vm1, %v1900_v35 }
 0x1e2   : > { %v1849_v12 = vpop.f32.mrf.mxu2 }
 0x1e3   : > { %v1850_v15 = vadd.f32 %v2888_v50, %v1849_v12 }
 0x1e5   : > { %v1901_v42 = vadd.f32 %v2115_v24, %v1850_v15 }
 0x1e7   : > { %1933 = vst.msk [vmem:[%s2905_s15 + $0xb0] sm:$0xff] %vm319_vm1, %v1901_v42 }
 0x1ea   : > { %v1852_v49 = vpop.f32.mrf.mxu2 }
 0x1eb   : > { %v1853_v16 = vadd.f32 %v2888_v50, %v1852_v49 }
 0x1ed   : > { %v1902_v59 = vadd.f32 %v2116_v8, %v1853_v16 }
 0x1ef   : > { %1934 = vst.msk [vmem:[%s2905_s15 + $0xb8] sm:$0xff] %vm319_vm1, %v1902_v59 }
 0x1f2   : > { %v1855_v43 = vpop.f32.mrf.mxu2 }
 0x1f3   : > { %v1856_v23 = vadd.f32 %v2888_v50, %v1855_v43 }
 0x1f5   : > { %v1903_v56 = vadd.f32 %v2117_v51, %v1856_v23 }
 0x1f7   : > { %1935 = vst.msk [vmem:[%s2905_s15 + $0xc0] sm:$0xff] %vm319_vm1, %v1903_v56 }
 0x1fa   : > { %v1858_v3 = vpop.f32.mrf.mxu2 }
 0x1fb   : > { %v1859_v32 = vadd.f32 %v2888_v50, %v1858_v3 }
 0x1fd   : > { %v1904_v2 = vadd.f32 %v2118_v45, %v1859_v32 }
 0x1ff   : > { %1936 = vst.msk [vmem:[%s2905_s15 + $0xc8] sm:$0xff] %vm319_vm1, %v1904_v2 }
 0x202   : > { %v1861_v31 = vpop.f32.mrf.mxu2 }
 0x203   : > { %v1862_v5 = vadd.f32 %v2888_v50, %v1861_v31 }
 0x205   : > { %v1905_v13 = vadd.f32 %v2119_v29, %v1862_v5 }
 0x207   : > { %1937 = vst.msk [vmem:[%s2905_s15 + $0xd0] sm:$0xff] %vm319_vm1, %v1905_v13 }
 0x20a   : > { %v1864_v40 = vpop.f32.mrf.mxu2 }
 0x20b   : > { %v1865_v62 = vadd.f32 %v2888_v50, %v1864_v40 }
 0x20d   : > { %v1906_v21 = vadd.f32 %v2120_v41, %v1865_v62 }
 0x20f   : > { %1938 = vst.msk [vmem:[%s2905_s15 + $0xd8] sm:$0xff] %vm319_vm1, %v1906_v21 }
 0x212   : > { %v1867_v48 = vpop.f32.mrf.mxu2 }
 0x213   : > { %v1868_v33 = vadd.f32 %v2888_v50, %v1867_v48 }
 0x215   : > { %v1907_v58 = vadd.f32 %v2121_v1, %v1868_v33 }
 0x217   : > { %1939 = vst.msk [vmem:[%s2905_s15 + $0xe0] sm:$0xff] %vm319_vm1, %v1907_v58 }
 0x21a   : > { %v1870_v4 = vpop.f32.mrf.mxu2 }
 0x21b   : > { %v1871_v44 = vadd.f32 %v2888_v50, %v1870_v4 }
 0x21d   : > { %v1908_v18 = vadd.f32 %v2122_v25, %v1871_v44 }
 0x21f   : > { %1940 = vst.msk [vmem:[%s2905_s15 + $0xe8] sm:$0xff] %vm319_vm1, %v1908_v18 }
 0x222   : > { %v1873_v17 = vpop.f32.mrf.mxu2 }
 0x223   : > { %v1874_v46 = vadd.f32 %v2888_v50, %v1873_v17 }
 0x225   : > { %v1909_v52 = vadd.f32 %v2123_v14, %v1874_v46 }
 0x227   : > { %1941 = vst.msk [vmem:[%s2905_s15 + $0xf0] sm:$0xff] %vm319_vm1, %v1909_v52 }
 0x22a   : > { %v1876_v28 = vpop.f32.mrf.mxu2 }
 0x22b   : > { %v1877_v60 = vadd.f32 %v2888_v50, %v1876_v28 }
 0x22d   : > { %v1910_v10 = vadd.f32 %v2124_v39, %v1877_v60 }
 0x22f   : > { %1942 = vst.msk [vmem:[%s2905_s15 + $0xf8] sm:$0xff] %vm319_vm1, %v1910_v10 }
 0x230 PF: > { %s17_s24 = sadd.s32 1, %s2131_s24  }
 0x231   : > { %p14_p4 = scmp.ge.s32.totalorder %s17_s24, 4  }
 0x233   :  { %16 = sbr.rel (!%p14_p4) target bundleno = 1 (0x1), region = 80 }

</bundles_post_ra>
